<compile_context>
chip_gen: v7x
topology: tpu7x:2x2x1
jax: 0.10.0
libtpu: 0.0.40
codegen_flags: <defaults>
</compile_context>

<pallas_src>
import functools

import jax
import jax.numpy as jnp
from jax import lax
from jax.experimental import pallas as pl
from jax.experimental.pallas import tpu as pltpu

LANE = 128
MAX_TILE = 512      # VMEM-safe everywhere (v5e 16 MiB scoped default included)


def _round_up(n, m):
    return (n + m - 1) // m * m


def _pad_to(a, shape):
    return jnp.pad(a, [(0, s - d) for d, s in zip(a.shape, shape)])


def _choose_tile(n, max_tile=MAX_TILE):
    """Small-N fast path (one grid step) else <=512 tiles with >=2 row tiles."""
    np_lane = _round_up(n, LANE)
    if np_lane <= max_tile:
        return np_lane
    half = _round_up((np_lane + 1) // 2, LANE)   # keep nI >= 2 for v7x megacore
    return min(max_tile, half)


# ------------------------------ kernels -------------------------------------


def gin1_kernel(x_ref, s_ref, b1_ref, w1_ref, w2_ref, h1_ref, z2_ref, acc_ref):
    """GIN layer 1, row tile i, reduction over column tiles k.

    acc_i = sum_k S[i,k] @ x_k          (bf16 x bf16 MXU, f32 accumulation)
    h1_i  = ReLU(acc_i @ W1 + b1)       (feature transform applied once / row tile)
    z2_i  = h1_i @ W2                   (bf16; streamed operand of layer 2)
    """
    k = pl.program_id(1)

    @pl.when(k == 0)
    def _():
        acc_ref[...] = jnp.zeros_like(acc_ref)

    acc_ref[...] += jnp.dot(s_ref[...], x_ref[...],
                            preferred_element_type=jnp.float32)

    @pl.when(k == pl.num_programs(1) - 1)
    def _():
        h1 = jnp.maximum(
            jnp.dot(acc_ref[...].astype(jnp.bfloat16), w1_ref[...],
                    preferred_element_type=jnp.float32) + b1_ref[...], 0.0)
        h1_ref[...] = h1
        z2_ref[...] = jnp.dot(h1.astype(jnp.bfloat16), w2_ref[...],
                              preferred_element_type=jnp.float32
                              ).astype(z2_ref.dtype)


def gin2_head_kernel(z_ref, s_ref, h1_ref, b2_ref, wf1_ref, wf2_ref, bf_ref,
                     out_ref, acc_ref, *, nclass):
    """GIN layer 2 fused with JumpingKnowledge('cat') + fc2 + log_softmax."""
    k = pl.program_id(1)

    @pl.when(k == 0)
    def _():
        acc_ref[...] = jnp.zeros_like(acc_ref)

    acc_ref[...] += jnp.dot(s_ref[...], z_ref[...],
                            preferred_element_type=jnp.float32)

    @pl.when(k == pl.num_programs(1) - 1)
    def _():
        h2 = jnp.maximum(acc_ref[...] + b2_ref[...], 0.0)
        # [h1 | h2] @ Wf + bf == h1 @ Wf1 + h2 @ Wf2 + bf  (cat never materialized)
        logits = (jnp.dot(h1_ref[...], wf1_ref[...],
                          preferred_element_type=jnp.float32)
                  + jnp.dot(h2, wf2_ref[...],
                            preferred_element_type=jnp.float32)
                  + bf_ref[...])
        # mask the lane-padding class columns out of the softmax
        col = lax.broadcasted_iota(jnp.int32, logits.shape, 1)
        logits = jnp.where(col < nclass, logits, jnp.float32(-1e30))
        m = jnp.max(logits, axis=1, keepdims=True)
        z = logits - m
        lse = jnp.log(jnp.sum(jnp.exp(z), axis=1, keepdims=True))
        out_ref[...] = z - lse


# ------------------------------ wrapper -------------------------------------


def jk_forward(x, adj, params, *, max_tile=MAX_TILE):
    """x: [N, F] float32 dense features; adj: [N, N] dense adjacency A[i, j] = w(i->j)."""
    N, F = x.shape
    H = params["w1"].shape[1]
    C = params["bf"].shape[1]

    HP = _round_up(H, LANE)            # lane-dense hidden dim
    CP = _round_up(C, LANE)            # lane-dense class dim
    tile = _choose_tile(N, max_tile)
    NP = _round_up(N, tile)
    nI = NP // tile
    nK = NP // tile

    # Aggregation operator S = (A + I)^T folds the GIN self term into the matmul
    # ((I + A^T) y == (A + I)^T y).  One wrapper-side transpose, reused by both
    # phases; bf16 is exact for the 0/1/2(/3) integer entries.
    s = (adj + jnp.eye(N, dtype=adj.dtype)).T
    s_p = _pad_to(s, (NP, NP)).astype(jnp.bfloat16)

    # zero-padded nodes/classes contribute exactly zero to real rows/columns
    x_p = _pad_to(x, (NP, F)).astype(jnp.bfloat16)
    w1 = _pad_to(params["w1"], (F, HP)).astype(jnp.bfloat16)
    b1 = _pad_to(params["b1"], (1, HP)).astype(jnp.float32)
    w2 = _pad_to(params["w2"], (HP, HP)).astype(jnp.bfloat16)
    b2 = _pad_to(params["b2"], (1, HP)).astype(jnp.float32)
    wf1 = _pad_to(params["wf1"], (HP, CP)).astype(jnp.float32)
    wf2 = _pad_to(params["wf2"], (HP, CP)).astype(jnp.float32)
    bf = _pad_to(params["bf"], (1, CP)).astype(jnp.float32)

    gin_cparams = pltpu.CompilerParams(
        dimension_semantics=("parallel", "arbitrary"))

    # ---- phase 1: GIN layer 1 (S @ x aggregation, W1 in epilogue), z2 = h1 @ W2 ----
    h1, z2 = pl.pallas_call(
        gin1_kernel,
        grid=(nI, nK),
        in_specs=[pl.BlockSpec((tile, F), lambda i, k: (k, 0)),       # x[k]  (bf16, narrow)
                  pl.BlockSpec((tile, tile), lambda i, k: (i, k)),    # S block (already transposed)
                  pl.BlockSpec((1, HP), lambda i, k: (0, 0)),         # b1
                  pl.BlockSpec((F, HP), lambda i, k: (0, 0)),         # W1
                  pl.BlockSpec((HP, HP), lambda i, k: (0, 0))],       # W2
        out_specs=(pl.BlockSpec((tile, HP), lambda i, k: (i, 0)),     # h1 (f32, head input)
                   pl.BlockSpec((tile, HP), lambda i, k: (i, 0))),    # z2 (bf16, layer-2 stream)
        out_shape=(jax.ShapeDtypeStruct((NP, HP), jnp.float32),
                   jax.ShapeDtypeStruct((NP, HP), jnp.bfloat16)),
        scratch_shapes=[pltpu.VMEM((tile, F), jnp.float32)],
        compiler_params=gin_cparams,
        cost_estimate=pl.CostEstimate(
            flops=2 * NP * NP * F + 2 * NP * F * HP + 2 * NP * HP * HP,
            transcendentals=0,
            bytes_accessed=NP * NP * 2            # S (bf16)
                           + nI * NP * F * 2      # x re-read once per row tile
                           + NP * HP * (4 + 2)    # h1 (f32) + z2 (bf16) writeback
                           + F * HP * 2 + HP * HP * 2),
    )(x_p, s_p, b1, w1, w2)

    # ---- phase 2: GIN layer 2 + JK('cat') + fc2 + log_softmax ----
    out_p = pl.pallas_call(
        functools.partial(gin2_head_kernel, nclass=C),
        grid=(nI, nK),
        in_specs=[pl.BlockSpec((tile, HP), lambda i, k: (k, 0)),      # z2[k] (bf16 stream)
                  pl.BlockSpec((tile, tile), lambda i, k: (i, k)),    # S block
                  pl.BlockSpec((tile, HP), lambda i, k: (i, 0)),      # h1[i] (JK cat half)
                  pl.BlockSpec((1, HP), lambda i, k: (0, 0)),         # b2
                  pl.BlockSpec((HP, CP), lambda i, k: (0, 0)),        # Wf (h1 half)
                  pl.BlockSpec((HP, CP), lambda i, k: (0, 0)),        # Wf (h2 half)
                  pl.BlockSpec((1, CP), lambda i, k: (0, 0))],        # bf
        out_specs=pl.BlockSpec((tile, CP), lambda i, k: (i, 0)),
        out_shape=jax.ShapeDtypeStruct((NP, CP), jnp.float32),
        scratch_shapes=[pltpu.VMEM((tile, HP), jnp.float32)],
        compiler_params=gin_cparams,
        cost_estimate=pl.CostEstimate(
            flops=2 * NP * NP * HP + 4 * NP * HP * CP,
            transcendentals=NP * CP,
            bytes_accessed=NP * NP * 2            # S (bf16)
                           + nI * NP * HP * 2     # z2 re-read once per row tile
                           + NP * HP * 4          # h1
                           + NP * CP * 4          # output
                           + 2 * HP * CP * 4),
    )(z2, s_p, h1, b2, wf1, wf2, bf)

    return out_p[:N, :C]


def jk_forward_ref(x, adj, params):
    """Pure-JAX f32 reference of the same forward pass (for correctness check)."""
    at = adj.T
    h1 = jnp.maximum((x + at @ x) @ params["w1"] + params["b1"], 0.0)
    h2 = jnp.maximum((h1 + at @ h1) @ params["w2"] + params["b2"], 0.0)
    logits = h1 @ params["wf1"] + h2 @ params["wf2"] + params["bf"]
    return jax.nn.log_softmax(logits, axis=1)


def init_params(key, nfeat, nhid, nclass):
    """Deterministic synthetic parameters (shapes follow JK.__init__)."""
    ks = jax.random.split(key, 6)

    def lin(kw, fan_in, fan_out):
        bound = 1.0 / jnp.sqrt(jnp.float32(fan_in))
        return jax.random.uniform(kw, (fan_in, fan_out), jnp.float32, -bound, bound)

    w1 = lin(ks[0], nfeat, nhid)
    b1 = jax.random.uniform(ks[1], (1, nhid), jnp.float32, -0.1, 0.1)
    w2 = lin(ks[2], nhid, nhid)
    b2 = jax.random.uniform(ks[3], (1, nhid), jnp.float32, -0.1, 0.1)
    wf = lin(ks[4], 2 * nhid, nclass)            # fc2: Linear(2*dim, nclass)
    bf = jax.random.uniform(ks[5], (1, nclass), jnp.float32, -0.1, 0.1)
    return {"w1": w1, "b1": b1, "w2": w2, "b2": b2,
            "wf1": wf[:nhid], "wf2": wf[nhid:], "bf": bf}


if __name__ == "__main__":
    N, NFEAT, NHID, NCLASS = 300, 16, 32, 8   # N not a lane multiple: exercises padding

    key = jax.random.PRNGKey(0)
    k_x, k_adj, k_p = jax.random.split(key, 3)

    x = jax.random.normal(k_x, (N, NFEAT), jnp.float32)

    # Dense adjacency with ~5% random edges + self loops (stands in for adj.to_dense()).
    mask = (jax.random.uniform(k_adj, (N, N)) < 0.05).astype(jnp.float32)
    adj = mask + jnp.eye(N, dtype=jnp.float32)

    params = init_params(k_p, NFEAT, NHID, NCLASS)

    out = jk_forward(x, adj, params)
    out = jax.block_until_ready(out)

    ref = jk_forward_ref(x, adj, params)
    assert out.shape == (N, NCLASS)
    # bf16 adjacency is exact (small-integer entries); the relaxed tolerance
    # covers the deliberate bf16 rounding of the streamed x / h1@W2 operands
    # (accuracy/perf tradeoff recommended by the review).
    assert jnp.allclose(out, ref, atol=5e-2, rtol=5e-2), \
        float(jnp.max(jnp.abs(out - ref)))

    print("KERNEL_OK")
</pallas_src>

<mosaic_0001>
module attributes {stable_mosaic.version = 11 : i64} {
  func.func @gin1_kernel(%arg0: i32, %arg1: i32, %arg2: memref<384x16xbf16, #tpu.memory_space<vmem>>, %arg3: memref<384x384xbf16, #tpu.memory_space<vmem>>, %arg4: memref<1x128xf32, #tpu.memory_space<vmem>>, %arg5: memref<16x128xbf16, #tpu.memory_space<vmem>>, %arg6: memref<128x128xbf16, #tpu.memory_space<vmem>>, %arg7: memref<384x128xf32, #tpu.memory_space<vmem>>, %arg8: memref<384x128xbf16, #tpu.memory_space<vmem>>, %arg9: memref<384x16xf32, #tpu.memory_space<vmem>>) attributes {dimension_semantics = [#tpu.dimension_semantics<parallel>, #tpu.dimension_semantics<arbitrary>], iteration_bounds = array<i64: 1, 1>, scalar_prefetch = 0 : i64, scratch_operands = 1 : i64, tpu.core_type = #tpu.core_type<tc>, window_params = [{transform_indices = @transform_0, window_bounds = array<i64: 384, 16>}, {transform_indices = @transform_1, window_bounds = array<i64: 384, 384>}, {pipeline_mode = #tpu.pipeline_mode<synchronous>, transform_indices = @transform_2, window_bounds = array<i64: 1, 128>}, {pipeline_mode = #tpu.pipeline_mode<synchronous>, transform_indices = @transform_3, window_bounds = array<i64: 16, 128>}, {pipeline_mode = #tpu.pipeline_mode<synchronous>, transform_indices = @transform_4, window_bounds = array<i64: 128, 128>}, {transform_indices = @transform_5, window_bounds = array<i64: 384, 128>}, {transform_indices = @transform_6, window_bounds = array<i64: 384, 128>}]} {
    %c0_i32 = arith.constant 0 : i32
    %0 = arith.cmpi eq, %arg1, %c0_i32 : i32
    %1 = arith.extui %0 : i1 to i32
    %c0_i32_0 = arith.constant 0 : i32
    %2 = arith.cmpi ne, %1, %c0_i32_0 : i32
    scf.if %2 {
      %cst_10 = arith.constant 0.000000e+00 : f32
      %12 = vector.broadcast %cst_10 : f32 to vector<384x16xf32>
      %c0_11 = arith.constant 0 : index
      %c0_12 = arith.constant 0 : index
      %13 = vector.load %arg9[%c0_11, %c0_12] : memref<384x16xf32, #tpu.memory_space<vmem>>, vector<384x16xf32>
      tpu.vector_store %arg9[%c0_11, %c0_12], %12 {strides = array<i32>} : memref<384x16xf32, #tpu.memory_space<vmem>>, vector<384x16xf32>,
    } else {
    }
    %c0 = arith.constant 0 : index
    %c0_1 = arith.constant 0 : index
    %3 = vector.load %arg9[%c0, %c0_1] : memref<384x16xf32, #tpu.memory_space<vmem>>, vector<384x16xf32>
    %c0_2 = arith.constant 0 : index
    %c0_3 = arith.constant 0 : index
    %4 = vector.load %arg3[%c0_2, %c0_3] : memref<384x384xbf16, #tpu.memory_space<vmem>>, vector<384x384xbf16>
    %c0_4 = arith.constant 0 : index
    %c0_5 = arith.constant 0 : index
    %5 = vector.load %arg2[%c0_4, %c0_5] : memref<384x16xbf16, #tpu.memory_space<vmem>>, vector<384x16xbf16>
    %cst = arith.constant dense<0.000000e+00> : vector<384x16xf32>
    %6 = tpu.matmul %4, %5, %cst {dimension_numbers = #tpu.dot_dimension_numbers<[1], [0], [0], [1], [0, 0, 1, 1], [], []>} : vector<384x384xbf16>, vector<384x16xbf16>, vector<384x16xf32> -> vector<384x16xf32>
    %7 = arith.addf %3, %6 : vector<384x16xf32>
    %c0_6 = arith.constant 0 : index
    %c0_7 = arith.constant 0 : index
    %8 = vector.load %arg9[%c0_6, %c0_7] : memref<384x16xf32, #tpu.memory_space<vmem>>, vector<384x16xf32>
    tpu.vector_store %arg9[%c0_6, %c0_7], %7 {strides = array<i32>} : memref<384x16xf32, #tpu.memory_space<vmem>>, vector<384x16xf32>,
    %c0_i32_8 = arith.constant 0 : i32
    %9 = arith.cmpi eq, %arg1, %c0_i32_8 : i32
    %10 = arith.extui %9 : i1 to i32
    %c0_i32_9 = arith.constant 0 : i32
    %11 = arith.cmpi ne, %10, %c0_i32_9 : i32
    scf.if %11 {
      %c0_10 = arith.constant 0 : index
      %c0_11 = arith.constant 0 : index
      %12 = vector.load %arg9[%c0_10, %c0_11] : memref<384x16xf32, #tpu.memory_space<vmem>>, vector<384x16xf32>
      %13 = arith.truncf %12 : vector<384x16xf32> to vector<384x16xbf16>
      %c0_12 = arith.constant 0 : index
      %c0_13 = arith.constant 0 : index
      %14 = vector.load %arg5[%c0_12, %c0_13] : memref<16x128xbf16, #tpu.memory_space<vmem>>, vector<16x128xbf16>
      %cst_14 = arith.constant dense<0.000000e+00> : vector<384x128xf32>
      %15 = tpu.matmul %13, %14, %cst_14 {dimension_numbers = #tpu.dot_dimension_numbers<[1], [0], [0], [1], [0, 0, 1, 1], [], []>} : vector<384x16xbf16>, vector<16x128xbf16>, vector<384x128xf32> -> vector<384x128xf32>
      %c0_15 = arith.constant 0 : index
      %c0_16 = arith.constant 0 : index
      %16 = vector.load %arg4[%c0_15, %c0_16] : memref<1x128xf32, #tpu.memory_space<vmem>>, vector<1x128xf32>
      %17 = vector.broadcast %16 : vector<1x128xf32> to vector<384x128xf32>
      %18 = arith.addf %15, %17 : vector<384x128xf32>
      %cst_17 = arith.constant 0.000000e+00 : f32
      %19 = vector.broadcast %cst_17 : f32 to vector<384x128xf32>
      %20 = arith.maximumf %18, %19 : vector<384x128xf32>
      %c0_18 = arith.constant 0 : index
      %c0_19 = arith.constant 0 : index
      %21 = vector.load %arg7[%c0_18, %c0_19] : memref<384x128xf32, #tpu.memory_space<vmem>>, vector<384x128xf32>
      tpu.vector_store %arg7[%c0_18, %c0_19], %20 {strides = array<i32>} : memref<384x128xf32, #tpu.memory_space<vmem>>, vector<384x128xf32>,
      %22 = arith.truncf %20 : vector<384x128xf32> to vector<384x128xbf16>
      %c0_20 = arith.constant 0 : index
      %c0_21 = arith.constant 0 : index
      %23 = vector.load %arg6[%c0_20, %c0_21] : memref<128x128xbf16, #tpu.memory_space<vmem>>, vector<128x128xbf16>
      %cst_22 = arith.constant dense<0.000000e+00> : vector<384x128xf32>
      %24 = tpu.matmul %22, %23, %cst_22 {dimension_numbers = #tpu.dot_dimension_numbers<[1], [0], [0], [1], [0, 0, 1, 1], [], []>} : vector<384x128xbf16>, vector<128x128xbf16>, vector<384x128xf32> -> vector<384x128xf32>
      %25 = arith.truncf %24 : vector<384x128xf32> to vector<384x128xbf16>
      %c0_23 = arith.constant 0 : index
      %c0_24 = arith.constant 0 : index
      %26 = vector.load %arg8[%c0_23, %c0_24] : memref<384x128xbf16, #tpu.memory_space<vmem>>, vector<384x128xbf16>
      tpu.vector_store %arg8[%c0_23, %c0_24], %25 {strides = array<i32>} : memref<384x128xbf16, #tpu.memory_space<vmem>>, vector<384x128xbf16>,
    } else {
    }
    return
  }
  func.func @transform_0(%arg0: i32, %arg1: i32) -> (i32, i32) {
    %c0_i32 = arith.constant 0 : i32
    %c0_i32_0 = arith.constant 0 : i32
    return %arg1, %c0_i32 : i32, i32
  }
  func.func @transform_1(%arg0: i32, %arg1: i32) -> (i32, i32) {
    %c0_i32 = arith.constant 0 : i32
    return %arg0, %arg1 : i32, i32
  }
  func.func @transform_2(%arg0: i32, %arg1: i32) -> (i32, i32) {
    %c0_i32 = arith.constant 0 : i32
    %c0_i32_0 = arith.constant 0 : i32
    %c0_i32_1 = arith.constant 0 : i32
    return %c0_i32, %c0_i32_0 : i32, i32
  }
  func.func @transform_3(%arg0: i32, %arg1: i32) -> (i32, i32) {
    %c0_i32 = arith.constant 0 : i32
    %c0_i32_0 = arith.constant 0 : i32
    %c0_i32_1 = arith.constant 0 : i32
    return %c0_i32, %c0_i32_0 : i32, i32
  }
  func.func @transform_4(%arg0: i32, %arg1: i32) -> (i32, i32) {
    %c0_i32 = arith.constant 0 : i32
    %c0_i32_0 = arith.constant 0 : i32
    %c0_i32_1 = arith.constant 0 : i32
    return %c0_i32, %c0_i32_0 : i32, i32
  }
  func.func @transform_5(%arg0: i32, %arg1: i32) -> (i32, i32) {
    %c0_i32 = arith.constant 0 : i32
    %c0_i32_0 = arith.constant 0 : i32
    return %arg0, %c0_i32 : i32, i32
  }
  func.func @transform_6(%arg0: i32, %arg1: i32) -> (i32, i32) {
    %c0_i32 = arith.constant 0 : i32
    %c0_i32_0 = arith.constant 0 : i32
    return %arg0, %c0_i32 : i32, i32
  }
}

</mosaic_0001>

<bundles_post_ra>
// kernel: tpu_custom_call.1
= control target key start
LH: loop header
LB: loop body
LE: loop exit
PB: predicated region body
PF: predicated region fallthrough
CT: control target
= control target key end

     0   :  { %12 = vsyncpa [#allocation4], 0  ;;  %s3858_s0 = inlined_call_operand.vmem [shape: bf16[384,16], index: 0, kind: input, shape index: {}]   ;;  %s3859_s1 = inlined_call_operand.hbm [shape: bf16[384,384], index: 1, kind: input, shape index: {}]   ;;  %s3860_s2 = inlined_call_operand.vmem [shape: f32[1,128], index: 2, kind: input, shape index: {}]   ;;  %s3861_s3 = inlined_call_operand.vmem [shape: bf16[16,128], index: 3, kind: input, shape index: {}]   ;;  %s3862_s4 = inlined_call_operand.vmem [shape: bf16[128,128], index: 4, kind: input, shape index: {}]   ;;  %s3863_s5 = inlined_call_operand.hbm [shape: f32[384,128], index: 5, kind: output, shape index: {0}]   ;;  %s3864_s6 = inlined_call_operand.hbm [shape: bf16[384,128], index: 6, kind: output, shape index: {1}]  }
   0x1   :  { %13 = vsyncpa [#allocation5], 0 }
   0x2   :  { %14 = vsyncpa [#allocation8], 0  ;;  %s3292_s21 = smov [#allocation3]   ;;  %s3220_s25 = scalar_lea.hbm %s3859_s1, 9216 }
   0x3   :  { %s22_s22 = sshll.u32 %s3292_s21, 4  ;;  %p3221_p0 = scmp.ne.s32.totalorder %s3859_s1, %s3220_s25  ;;  %s23_s22 = int_to_ptr.vmem [resolvable:$true] %s22_s22 }
   0x4   :  { %p3224_p1 = scmp.lt.u32.totalorder %s3220_s25, %s3859_s1 }
   0x6   :  { %p3226_p2 = pnand %p3224_p1, %p3221_p0 }
   0x8   :  { %3229 = shalt.err (!%p3226_p2)
}
   0x9   :  { %s3230_s30 = scalar_lea.vmem %s23_s22, 9216  ;;  %p3235_p4 = scmp.lt.s32.totalorder %s23_s22, %s23_s22 }
   0xa   :  { %p3231_p3 = scmp.ne.s32.totalorder %s23_s22, %s3230_s30  ;;  %p3236_p5 = scmp.lt.s32.totalorder %s3230_s30, %s3230_s30 }
   0xc   :  { %p3237_p6 = por %p3236_p5, %p3235_p4 }
   0xe   :  { %p3238_p7 = pnand %p3237_p6, %p3231_p3 }
  0x10   :  { %3241 = shalt.err (!%p3238_p7)
}
  0x11   :  { %s3293_s7 = smov 192   ;;  %s3294_s8 = smov 12  }
  0x12   :  { %28 = dma.hbm_to_vmem [thread:$0]  %s3859_s1, 9216, %s23_s22, [#allocation4], %s3293_s7, %s3293_s7, %s3294_s8  }
  0x13   :  { %3286 = dma.done.wait [#allocation4], 9216  }
  0x14   :  { %3287 = vsyncadd [#allocation4], 4294958080  ;;  %v3295_v0 = vmov 0   ;;  %v3091_v1 = vld [vmem:[%s3858_s0] sm:$0xff]   ;;  %v3092_v2 = vld [vmem:[%s3858_s0 + $0x8] sm:$0xff]   ;;  %vm43_vm0 = vcmask 130048  }
  0x15   :  { %812 = vmatprep.subr.bf16.mxu0 %v3295_v0  ;;  %v3093_v3 = vld [vmem:[%s3858_s0 + $0x10] sm:$0xff]   ;;  %v3094_v4 = vld [vmem:[%s3858_s0 + $0x18] sm:$0xff]   ;;  %v3095_v5 = vld [vmem:[%s3858_s0 + $0x20] sm:$0xff]  }
  0x16   :  { %813 = vmatpush1.bf16.msra.mxu0 %v3091_v1  ;;  %v3096_v6 = vld [vmem:[%s3858_s0 + $0x28] sm:$0xff]   ;;  %v3109_v7 = vld [vmem:[#allocation3 + $0x4] ss:$12 sps:$4 sm:$0xff]   ;;  %v3098_v11 = vld [vmem:[%s3858_s0 + $0x38] sm:$0xff]  }
  0x17   :  { %814 = vmatprep.subr.bf16.mxu0 %v3295_v0  ;;  %v3376_v8 = vld [vmem:[%s3858_s0 + $0x80] sm:$0xff]   ;;  %844 = vmatprep.mubr.bf16.mxu0 %v3109_v7  ;;  %v3097_v9 = vld [vmem:[%s3858_s0 + $0x30] sm:$0xff]   ;;  %v3388_v10 = vld [vmem:[%s3858_s0 + $0x88] sm:$0xff]  }
  0x18   :  { %3064 = vmatprep.subr.bf16.mxu1 %v3376_v8  ;;  %v3398_v12 = vld [vmem:[%s3858_s0 + $0x90] sm:$0xff]   ;;  %v3404_v13 = vld [vmem:[%s3858_s0 + $0x98] sm:$0xff]   ;;  %v3099_v14 = vld [vmem:[%s3858_s0 + $0x40] sm:$0xff]  }
  0x19   :  { %3072 = vmatpush3.bf16.msra.mxu1 %v3376_v8  ;;  %v3416_v15 = vld [vmem:[%s3858_s0 + $0xa0] sm:$0xff]   ;;  %v3100_v16 = vld [vmem:[%s3858_s0 + $0x48] sm:$0xff]   ;;  %v3101_v19 = vld [vmem:[%s3858_s0 + $0x50] sm:$0xff]  }
  0x1a   :  { %815 = vmatpush1.bf16.msra.mxu0 %v3092_v2  ;;  %3065 = vmatprep.subr.bf16.mxu1 %v3388_v10  ;;  %v3425_v17 = vld [vmem:[%s3858_s0 + $0xa8] sm:$0xff]   ;;  %v3438_v20 = vld [vmem:[%s3858_s0 + $0xb0] sm:$0xff]   ;;  %v3102_v21 = vld [vmem:[%s3858_s0 + $0x58] sm:$0xff]  }
  0x1b   :  { %816 = vmatprep.subr.bf16.mxu0 %v3295_v0  ;;  %v3139_v18 = vld [vmem:[#allocation3 + $0xc8] ss:$12 sps:$4 sm:$0xff]   ;;  %v3449_v22 = vld [vmem:[%s3858_s0 + $0xb8] sm:$0xff]   ;;  %v3103_v23 = vld [vmem:[%s3858_s0 + $0x60] sm:$0xff]  }
  0x1c   :  { %2918 = vmatprep.mubr.bf16.mxu1 %v3139_v18  ;;  %v3104_v24 = vld [vmem:[%s3858_s0 + $0x68] sm:$0xff]   ;;  %v3147_v26 = vld [vmem:[#allocation3 + $0xf8] ss:$12 sps:$4 sm:$0xff]   ;;  %v3105_v27 = vld [vmem:[%s3858_s0 + $0x70] sm:$0xff]  }
  0x1d   :  { %3073 = vmatpush3.bf16.msra.mxu1 %v3388_v10  ;;  %v3142_v25 = vld [vmem:[#allocation3 + $0xe0] ss:$12 sps:$4 sm:$0xff]   ;;  %v3150_v28 = vld [vmem:[#allocation3 + $0x110] ss:$12 sps:$4 sm:$0xff]   ;;  %v3155_v30 = vld [vmem:[#allocation3 + $0x128] ss:$12 sps:$4 sm:$0xff]  }
  0x1e   :  { %817 = vmatpush1.bf16.msra.mxu0 %v3093_v3  ;;  %3066 = vmatprep.subr.bf16.mxu1 %v3398_v12  ;;  %v3106_v29 = vld [vmem:[%s3858_s0 + $0x78] sm:$0xff]   ;;  %v3107_v31 = vld [vmem:[#allocation3] ss:$12 sps:$4 sm:$0xff]   ;;  %v3171_v38 = vld [vmem:[#allocation3 + $0x188] ss:$12 sps:$4 sm:$0xff]  }
  0x1f   :  { %818 = vmatprep.subr.bf16.mxu0 %v3295_v0  ;;  %v3111_v32 = vld [vmem:[#allocation3 + $0x1c] ss:$12 sps:$4 sm:$0xff]   ;;  %v3158_v33 = vld [vmem:[#allocation3 + $0x140] ss:$12 sps:$4 sm:$0xff]   ;;  %v3163_v34 = vld [vmem:[#allocation3 + $0x158] ss:$12 sps:$4 sm:$0xff]  }
  0x20   :  { %v3113_v35 = vld [vmem:[#allocation3 + $0x18] ss:$12 sps:$4 sm:$0xff]   ;;  %v3114_v36 = vld [vmem:[#allocation3 + $0x34] ss:$12 sps:$4 sm:$0xff]   ;;  %v3166_v37 = vld [vmem:[#allocation3 + $0x170] ss:$12 sps:$4 sm:$0xff]  }
  0x21   :  { %3074 = vmatpush3.bf16.msra.mxu1 %v3398_v12  ;;  %v3116_v39 = vld [vmem:[#allocation3 + $0x30] ss:$12 sps:$4 sm:$0xff]   ;;  %v3117_v40 = vld [vmem:[#allocation3 + $0x4c] ss:$12 sps:$4 sm:$0xff]   ;;  %v3119_v43 = vld [vmem:[#allocation3 + $0x48] ss:$12 sps:$4 sm:$0xff]  }
  0x22   :  { %819 = vmatpush1.bf16.msra.mxu0 %v3094_v4  ;;  %3067 = vmatprep.subr.bf16.mxu1 %v3404_v13  ;;  %v3174_v41 = vld [vmem:[#allocation3 + $0x1a0] ss:$12 sps:$4 sm:$0xff]   ;;  %v3179_v42 = vld [vmem:[#allocation3 + $0x1b8] ss:$12 sps:$4 sm:$0xff]   ;;  %v3182_v45 = vld [vmem:[#allocation3 + $0x1d0] ss:$12 sps:$4 sm:$0xff]  }
  0x23   :  { %820 = vmatprep.subr.bf16.mxu0 %v3295_v0  ;;  %v3121_v44 = vld [vmem:[#allocation3 + $0x64] ss:$12 sps:$4 sm:$0xff]   ;;  %v3187_v46 = vld [vmem:[#allocation3 + $0x1e8] ss:$12 sps:$4 sm:$0xff]   ;;  %v3123_v47 = vld [vmem:[#allocation3 + $0x60] ss:$12 sps:$4 sm:$0xff]  }
  0x24   :  { %v3124_v48 = vld [vmem:[#allocation3 + $0x7c] ss:$12 sps:$4 sm:$0xff]   ;;  %v3190_v49 = vld [vmem:[#allocation3 + $0x200] ss:$12 sps:$4 sm:$0xff]   ;;  %v3127_v50 = vld [vmem:[#allocation3 + $0x78] ss:$12 sps:$4 sm:$0xff]  }
  0x25   :  { %3075 = vmatpush3.bf16.msra.mxu1 %v3404_v13  ;;  %v3129_v51 = vld [vmem:[#allocation3 + $0x94] ss:$12 sps:$4 sm:$0xff]   ;;  %v3195_v52 = vld [vmem:[#allocation3 + $0x218] ss:$12 sps:$4 sm:$0xff]   ;;  %v3198_v53 = vld [vmem:[#allocation3 + $0x230] ss:$12 sps:$4 sm:$0xff]  }
  0x26   :  { %821 = vmatpush1.bf16.msra.mxu0 %v3095_v5  ;;  %3068 = vmatprep.subr.bf16.mxu1 %v3416_v15  ;;  %v3132_v54 = vld [vmem:[#allocation3 + $0x90] ss:$12 sps:$4 sm:$0xff]   ;;  %v3134_v55 = vld [vmem:[#allocation3 + $0xac] ss:$12 sps:$4 sm:$0xff]   ;;  %v3137_v56 = vld [vmem:[#allocation3 + $0xa8] ss:$12 sps:$4 sm:$0xff]  }
  0x27   :  { %822 = vmatprep.subr.bf16.mxu0 %v3295_v0  ;;  %v3140_v57 = vld [vmem:[#allocation3 + $0xc4] ss:$12 sps:$4 sm:$0xff]   ;;  %v3143_v58 = vld [vmem:[#allocation3 + $0xc0] ss:$12 sps:$4 sm:$0xff]   ;;  %v3144_v59 = vld [vmem:[#allocation3 + $0xdc] ss:$12 sps:$4 sm:$0xff]  }
  0x28   :  { %v3146_v60 = vld [vmem:[#allocation3 + $0xd8] ss:$12 sps:$4 sm:$0xff]   ;;  %v3148_v61 = vld [vmem:[#allocation3 + $0xf4] ss:$12 sps:$4 sm:$0xff]   ;;  %v3151_v62 = vld [vmem:[#allocation3 + $0xf0] ss:$12 sps:$4 sm:$0xff]  }
  0x29   :  { %3076 = vmatpush3.bf16.msra.mxu1 %v3416_v15  ;;  %v3152_v63 = vld [vmem:[#allocation3 + $0x10c] ss:$12 sps:$4 sm:$0xff]   ;;  %v3156_v1 = vld [vmem:[#allocation3 + $0x124] ss:$12 sps:$4 sm:$0xff]   ;;  %v3160_v3 = vld [vmem:[#allocation3 + $0x13c] ss:$12 sps:$4 sm:$0xff]  }
  0x2a   :  { %823 = vmatpush1.bf16.msra.mxu0 %v3096_v6  ;;  %3069 = vmatprep.subr.bf16.mxu1 %v3425_v17  ;;  %v3159_v2 = vld [vmem:[#allocation3 + $0x120] ss:$12 sps:$4 sm:$0xff]   ;;  %v3162_v4 = vld [vmem:[#allocation3 + $0x138] ss:$12 sps:$4 sm:$0xff]   ;;  %v3167_v6 = vld [vmem:[#allocation3 + $0x150] ss:$12 sps:$4 sm:$0xff]  }
  0x2b   :  { %824 = vmatprep.subr.bf16.mxu0 %v3295_v0  ;;  %v3164_v5 = vld [vmem:[#allocation3 + $0x154] ss:$12 sps:$4 sm:$0xff]   ;;  %v3168_v7 = vld [vmem:[#allocation3 + $0x16c] ss:$12 sps:$4 sm:$0xff]   ;;  %v3188_v18 = vld [vmem:[#allocation3 + $0x1e4] ss:$12 sps:$4 sm:$0xff]  }
  0x2d   :  { %3077 = vmatpush3.bf16.msra.mxu1 %v3425_v17 }
  0x2e   :  { %825 = vmatpush1.bf16.msra.mxu0 %v3097_v9  ;;  %3070 = vmatprep.subr.bf16.mxu1 %v3438_v20  ;;  %v3172_v9 = vld [vmem:[#allocation3 + $0x184] ss:$12 sps:$4 sm:$0xff]  }
  0x2f   :  { %826 = vmatprep.subr.bf16.mxu0 %v3295_v0 }
  0x31   :  { %3078 = vmatpush3.bf16.msra.mxu1 %v3438_v20 }
  0x32   :  { %827 = vmatpush1.bf16.msra.mxu0 %v3098_v11  ;;  %3071 = vmatprep.subr.bf16.mxu1 %v3449_v22  ;;  %v3176_v11 = vld [vmem:[#allocation3 + $0x19c] ss:$12 sps:$4 sm:$0xff]  }
  0x33   :  { %828 = vmatprep.subr.bf16.mxu0 %v3295_v0 }
  0x35   :  { %3079 = vmatpush3.bf16.msra.mxu1 %v3449_v22 }
  0x36   :  { %829 = vmatpush1.bf16.msra.mxu0 %v3099_v14  ;;  %v3183_v14 = vld [vmem:[#allocation3 + $0x1b0] ss:$12 sps:$4 sm:$0xff]  }
  0x37   :  { %830 = vmatprep.subr.bf16.mxu0 %v3295_v0 }
  0x38   :  { %2919 = vmatmul.mubr.bf16.vlgmr.msra.gmra.mrb[0].mxu1 %v3142_v25  ;;  %v3202_v25 = vld [vmem:[#allocation3 + $0x228] ss:$12 sps:$4 sm:$0xff]  }
  0x39   :  { %2922 = vmatprep.mubr.bf16.mxu1 %v3147_v26  ;;  %v3203_v26 = vld [vmem:[#allocation3 + $0x8] ss:$12 sps:$4 sm:$0xff]  }
  0x3a   :  { %831 = vmatpush1.bf16.msra.mxu0 %v3100_v16  ;;  %v3296_v16 = vmov 0.0  }
  0x3b   :  { %832 = vmatprep.subr.bf16.mxu0 %v3295_v0  ;;  %60 = vst.msk [vmem:[#allocation2 + $0x80] sm:$0xff] %vm43_vm0, %v3296_v16  ;;  %44 = vst.msk [vmem:[#allocation2] sm:$0xff] %vm43_vm0, %v3296_v16 }
  0x3c   :  { %45 = vst.msk [vmem:[#allocation2 + $0x8] sm:$0xff] %vm43_vm0, %v3296_v16  ;;  %46 = vst.msk [vmem:[#allocation2 + $0x10] sm:$0xff] %vm43_vm0, %v3296_v16 }
  0x3d   :  { %47 = vst.msk [vmem:[#allocation2 + $0x18] sm:$0xff] %vm43_vm0, %v3296_v16  ;;  %48 = vst.msk [vmem:[#allocation2 + $0x20] sm:$0xff] %vm43_vm0, %v3296_v16 }
  0x3e   :  { %833 = vmatpush1.bf16.msra.mxu0 %v3101_v19  ;;  %49 = vst.msk [vmem:[#allocation2 + $0x28] sm:$0xff] %vm43_vm0, %v3296_v16  ;;  %50 = vst.msk [vmem:[#allocation2 + $0x30] sm:$0xff] %vm43_vm0, %v3296_v16  ;;  %v3191_v19 = vld [vmem:[#allocation3 + $0x1e0] ss:$12 sps:$4 sm:$0xff]  }
  0x3f   :  { %834 = vmatprep.subr.bf16.mxu0 %v3295_v0  ;;  %51 = vst.msk [vmem:[#allocation2 + $0x38] sm:$0xff] %vm43_vm0, %v3296_v16  ;;  %52 = vst.msk [vmem:[#allocation2 + $0x40] sm:$0xff] %vm43_vm0, %v3296_v16 }
  0x40   :  { %2923 = vmatmul.mubr.bf16.gmra.mrb[4].mxu1 %v3150_v28  ;;  %53 = vst.msk [vmem:[#allocation2 + $0x48] sm:$0xff] %vm43_vm0, %v3296_v16  ;;  %54 = vst.msk [vmem:[#allocation2 + $0x50] sm:$0xff] %vm43_vm0, %v3296_v16  ;;  %v3205_v28 = vld [vmem:[#allocation3 + $0x38] ss:$12 sps:$4 sm:$0xff]  }
  0x41   :  { %2926 = vmatprep.mubr.bf16.mxu1 %v3155_v30  ;;  %55 = vst.msk [vmem:[#allocation2 + $0x58] sm:$0xff] %vm43_vm0, %v3296_v16  ;;  %56 = vst.msk [vmem:[#allocation2 + $0x60] sm:$0xff] %vm43_vm0, %v3296_v16  ;;  %v3207_v30 = vld [vmem:[#allocation3 + $0x68] ss:$12 sps:$4 sm:$0xff]  }
  0x42   :  { %835 = vmatpush1.bf16.msra.mxu0 %v3102_v21  ;;  %57 = vst.msk [vmem:[#allocation2 + $0x68] sm:$0xff] %vm43_vm0, %v3296_v16  ;;  %58 = vst.msk [vmem:[#allocation2 + $0x70] sm:$0xff] %vm43_vm0, %v3296_v16  ;;  %v3194_v21 = vld [vmem:[#allocation3 + $0x1f8] ss:$12 sps:$4 sm:$0xff]  }
  0x43   :  { %836 = vmatprep.subr.bf16.mxu0 %v3295_v0  ;;  %59 = vst.msk [vmem:[#allocation2 + $0x78] sm:$0xff] %vm43_vm0, %v3296_v16  ;;  %61 = vst.msk [vmem:[#allocation2 + $0x88] sm:$0xff] %vm43_vm0, %v3296_v16 }
  0x44   :  { %62 = vst.msk [vmem:[#allocation2 + $0x90] sm:$0xff] %vm43_vm0, %v3296_v16  ;;  %63 = vst.msk [vmem:[#allocation2 + $0x98] sm:$0xff] %vm43_vm0, %v3296_v16 }
  0x45   :  { %64 = vst.msk [vmem:[#allocation2 + $0xa0] sm:$0xff] %vm43_vm0, %v3296_v16  ;;  %65 = vst.msk [vmem:[#allocation2 + $0xa8] sm:$0xff] %vm43_vm0, %v3296_v16 }
  0x46   :  { %837 = vmatpush1.bf16.msra.mxu0 %v3103_v23  ;;  %66 = vst.msk [vmem:[#allocation2 + $0xb0] sm:$0xff] %vm43_vm0, %v3296_v16  ;;  %67 = vst.msk [vmem:[#allocation2 + $0xb8] sm:$0xff] %vm43_vm0, %v3296_v16  ;;  %v3199_v23 = vld [vmem:[#allocation3 + $0x210] ss:$12 sps:$4 sm:$0xff]  }
  0x47   :  { %838 = vmatprep.subr.bf16.mxu0 %v3295_v0  ;;  %68 = vst.msk [vmem:[#allocation2 + $0xc0] sm:$0xff] %vm43_vm0, %v3296_v16  ;;  %69 = vst.msk [vmem:[#allocation2 + $0xc8] sm:$0xff] %vm43_vm0, %v3296_v16 }
  0x48   :  { %2927 = vmatmul.mubr.bf16.gmra.mrb[8].mxu1 %v3158_v33  ;;  %70 = vst.msk [vmem:[#allocation2 + $0xd0] sm:$0xff] %vm43_vm0, %v3296_v16  ;;  %71 = vst.msk [vmem:[#allocation2 + $0xd8] sm:$0xff] %vm43_vm0, %v3296_v16 }
  0x49   :  { %2930 = vmatprep.mubr.bf16.mxu1 %v3163_v34  ;;  %72 = vst.msk [vmem:[#allocation2 + $0xe0] sm:$0xff] %vm43_vm0, %v3296_v16  ;;  %73 = vst.msk [vmem:[#allocation2 + $0xe8] sm:$0xff] %vm43_vm0, %v3296_v16 }
  0x4a   :  { %839 = vmatpush1.bf16.msra.mxu0 %v3104_v24  ;;  %74 = vst.msk [vmem:[#allocation2 + $0xf0] sm:$0xff] %vm43_vm0, %v3296_v16  ;;  %75 = vst.msk [vmem:[#allocation2 + $0xf8] sm:$0xff] %vm43_vm0, %v3296_v16  ;;  %v3200_v24 = vld [vmem:[#allocation3 + $0x22c] ss:$12 sps:$4 sm:$0xff]  }
  0x4b   :  { %840 = vmatprep.subr.bf16.mxu0 %v3295_v0  ;;  %76 = vst.msk [vmem:[#allocation2 + $0x100] sm:$0xff] %vm43_vm0, %v3296_v16  ;;  %77 = vst.msk [vmem:[#allocation2 + $0x108] sm:$0xff] %vm43_vm0, %v3296_v16 }
  0x4c   :  { %78 = vst.msk [vmem:[#allocation2 + $0x110] sm:$0xff] %vm43_vm0, %v3296_v16  ;;  %79 = vst.msk [vmem:[#allocation2 + $0x118] sm:$0xff] %vm43_vm0, %v3296_v16 }
  0x4d   :  { %80 = vst.msk [vmem:[#allocation2 + $0x120] sm:$0xff] %vm43_vm0, %v3296_v16  ;;  %81 = vst.msk [vmem:[#allocation2 + $0x128] sm:$0xff] %vm43_vm0, %v3296_v16 }
  0x4e   :  { %841 = vmatpush1.bf16.msra.mxu0 %v3105_v27  ;;  %82 = vst.msk [vmem:[#allocation2 + $0x130] sm:$0xff] %vm43_vm0, %v3296_v16  ;;  %83 = vst.msk [vmem:[#allocation2 + $0x138] sm:$0xff] %vm43_vm0, %v3296_v16  ;;  %v3204_v27 = vld [vmem:[#allocation3 + $0x20] ss:$12 sps:$4 sm:$0xff]  }
  0x4f   :  { %842 = vmatprep.subr.bf16.mxu0 %v3295_v0  ;;  %v3154_v0 = vld [vmem:[#allocation3 + $0x108] ss:$12 sps:$4 sm:$0xff]   ;;  %84 = vst.msk [vmem:[#allocation2 + $0x140] sm:$0xff] %vm43_vm0, %v3296_v16  ;;  %85 = vst.msk [vmem:[#allocation2 + $0x148] sm:$0xff] %vm43_vm0, %v3296_v16 }
  0x50   :  { %2931 = vmatmul.mubr.bf16.gmra.mrb[12].mxu1 %v3166_v37  ;;  %86 = vst.msk [vmem:[#allocation2 + $0x150] sm:$0xff] %vm43_vm0, %v3296_v16  ;;  %87 = vst.msk [vmem:[#allocation2 + $0x158] sm:$0xff] %vm43_vm0, %v3296_v16 }
  0x51   :  { %2934 = vmatprep.mubr.bf16.mxu1 %v3171_v38  ;;  %88 = vst.msk [vmem:[#allocation2 + $0x160] sm:$0xff] %vm43_vm0, %v3296_v16  ;;  %89 = vst.msk [vmem:[#allocation2 + $0x168] sm:$0xff] %vm43_vm0, %v3296_v16 }
  0x52   :  { %843 = vmatpush1.bf16.msra.mxu0 %v3106_v29  ;;  %90 = vst.msk [vmem:[#allocation2 + $0x170] sm:$0xff] %vm43_vm0, %v3296_v16  ;;  %91 = vst.msk [vmem:[#allocation2 + $0x178] sm:$0xff] %vm43_vm0, %v3296_v16  ;;  %v3206_v29 = vld [vmem:[#allocation3 + $0x50] ss:$12 sps:$4 sm:$0xff]  }
  0x53   :  { %2886 = vmatprep.subr.bf16.mxu0 %v3376_v8 }
  0x55   :  { %845 = vmatmul.mubr.bf16.vlgmr.msra.gmra.mrb[0].mxu0 %v3107_v31 }
  0x56   :  { %2887 = vmatpush3.bf16.msra.mxu0 %v3376_v8  ;;  %852 = vmatprep.mubr.bf16.mxu0 %v3111_v32  ;;  %v3170_v8 = vld [vmem:[#allocation3 + $0x168] ss:$12 sps:$4 sm:$0xff]  }
  0x57   :  { %2888 = vmatprep.subr.bf16.mxu0 %v3388_v10 }
  0x58   :  { %2935 = vmatmul.mubr.bf16.gmra.mrb[16].mxu1 %v3174_v41 }
  0x59   :  { %2938 = vmatprep.mubr.bf16.mxu1 %v3179_v42 }
  0x5a   :  { %2889 = vmatpush3.bf16.msra.mxu0 %v3388_v10  ;;  %v3175_v10 = vld [vmem:[#allocation3 + $0x180] ss:$12 sps:$4 sm:$0xff]  }
  0x5b   :  { %2890 = vmatprep.subr.bf16.mxu0 %v3398_v12 }
  0x5d   :  { %853 = vmatmul.mubr.bf16.gmra.mrb[4].mxu0 %v3113_v35  ;;  %v3208_v35 = vld [vmem:[#allocation3 + $0x80] ss:$12 sps:$4 sm:$0xff]  }
  0x5e   :  { %860 = vmatprep.mubr.bf16.mxu0 %v3114_v36  ;;  %2891 = vmatpush3.bf16.msra.mxu0 %v3398_v12  ;;  %v3178_v12 = vld [vmem:[#allocation3 + $0x198] ss:$12 sps:$4 sm:$0xff]  }
  0x5f   :  { %2892 = vmatprep.subr.bf16.mxu0 %v3404_v13  ;;  %v3209_v36 = vld [vmem:[#allocation3 + $0x98] ss:$12 sps:$4 sm:$0xff]  }
  0x60   :  { %2939 = vmatmul.mubr.bf16.gmra.mrb[20].mxu1 %v3182_v45 }
  0x61   :  { %2942 = vmatprep.mubr.bf16.mxu1 %v3187_v46 }
  0x62   :  { %2893 = vmatpush3.bf16.msra.mxu0 %v3404_v13  ;;  %v3180_v13 = vld [vmem:[#allocation3 + $0x1b4] ss:$12 sps:$4 sm:$0xff]  }
  0x63   :  { %2894 = vmatprep.subr.bf16.mxu0 %v3416_v15 }
  0x65   :  { %861 = vmatmul.mubr.bf16.gmra.mrb[8].mxu0 %v3116_v39 }
  0x66   :  { %868 = vmatprep.mubr.bf16.mxu0 %v3117_v40  ;;  %2895 = vmatpush3.bf16.msra.mxu0 %v3416_v15  ;;  %v3184_v15 = vld [vmem:[#allocation3 + $0x1cc] ss:$12 sps:$4 sm:$0xff]  }
  0x67   :  { %2896 = vmatprep.subr.bf16.mxu0 %v3425_v17 }
  0x68   :  { %2943 = vmatmul.mubr.bf16.gmra.mrb[24].mxu1 %v3190_v49 }
  0x69   :  { %2946 = vmatprep.mubr.bf16.mxu1 %v3195_v52 }
  0x6a   :  { %2897 = vmatpush3.bf16.msra.mxu0 %v3425_v17  ;;  %v3186_v17 = vld [vmem:[#allocation3 + $0x1c8] ss:$12 sps:$4 sm:$0xff]  }
  0x6b   :  { %2898 = vmatprep.subr.bf16.mxu0 %v3438_v20 }
  0x6d   :  { %869 = vmatmul.mubr.bf16.gmra.mrb[12].mxu0 %v3119_v43  ;;  %v3210_v43 = vld [vmem:[#allocation3 + $0xb0] ss:$12 sps:$4 sm:$0xff]  }
  0x6e   :  { %876 = vmatprep.mubr.bf16.mxu0 %v3121_v44  ;;  %2899 = vmatpush3.bf16.msra.mxu0 %v3438_v20  ;;  %v3192_v20 = vld [vmem:[#allocation3 + $0x1fc] ss:$12 sps:$4 sm:$0xff]  }
  0x6f   :  { %2900 = vmatprep.subr.bf16.mxu0 %v3449_v22 }
  0x70   :  { %2947 = vmatmul.mubr.bf16.gmra.mrb[28].mxu1 %v3198_v53 }
  0x72   :  { %2901 = vmatpush3.bf16.msra.mxu0 %v3449_v22  ;;  %v3196_v22 = vld [vmem:[#allocation3 + $0x214] ss:$12 sps:$4 sm:$0xff]  }
  0x75   :  { %877 = vmatmul.mubr.bf16.gmra.mrb[16].mxu0 %v3123_v47 }
  0x76   :  { %884 = vmatprep.mubr.bf16.mxu0 %v3124_v48 }
  0x7d   :  { %885 = vmatmul.mubr.bf16.gmra.mrb[20].mxu0 %v3127_v50 }
  0x7e   :  { %892 = vmatprep.mubr.bf16.mxu0 %v3129_v51 }
  0x85   :  { %893 = vmatmul.mubr.bf16.gmra.mrb[24].mxu0 %v3132_v54 }
  0x86   :  { %900 = vmatprep.mubr.bf16.mxu0 %v3134_v55 }
  0x8d   :  { %901 = vmatmul.mubr.bf16.gmra.mrb[28].mxu0 %v3137_v56 }
  0x8e   :  { %908 = vmatprep.mubr.bf16.mxu0 %v3140_v57 }
  0x95   :  { %909 = vmatmul.mubr.bf16.gmra.mrb[32].mxu0 %v3143_v58 }
  0x96   :  { %916 = vmatprep.mubr.bf16.mxu0 %v3144_v59 }
  0x9d   :  { %917 = vmatmul.mubr.bf16.gmra.mrb[36].mxu0 %v3146_v60 }
  0x9e   :  { %924 = vmatprep.mubr.bf16.mxu0 %v3148_v61 }
  0xa5   :  { %925 = vmatmul.mubr.bf16.gmra.mrb[40].mxu0 %v3151_v62 }
  0xa6   :  { %932 = vmatprep.mubr.bf16.mxu0 %v3152_v63 }
  0xad   :  { %933 = vmatmul.mubr.bf16.gmra.mrb[44].mxu0 %v3154_v0 }
  0xae   :  { %940 = vmatprep.mubr.bf16.mxu0 %v3156_v1 }
  0xb5   :  { %941 = vmatmul.mubr.bf16.gmra.mrb[48].mxu0 %v3159_v2  ;;  %v3211_v2 = vld [vmem:[%s3861_s3] sm:$0xff]  }
  0xb6   :  { %948 = vmatprep.mubr.bf16.mxu0 %v3160_v3  ;;  %2950 = vmatprep.subr.bf16.mxu1 %v3211_v2 }
  0xb7   :  { %2951 = vmatpush3.bf16.msra.mxu1 %v3211_v2  ;;  %v109_v2 = vld [vmem:[#allocation2 + $0x88] sm:$0xff] }
  0xbd   :  { %949 = vmatmul.mubr.bf16.gmra.mrb[52].mxu0 %v3162_v4 }
  0xbe   :  { %956 = vmatprep.mubr.bf16.mxu0 %v3164_v5 }
  0xc5   :  { %957 = vmatmul.mubr.bf16.gmra.mrb[56].mxu0 %v3167_v6 }
  0xc6   :  { %964 = vmatprep.mubr.bf16.mxu0 %v3168_v7 }
  0xcd   :  { %965 = vmatmul.mubr.bf16.gmra.mrb[60].mxu0 %v3170_v8 }
  0xce   :  { %972 = vmatprep.mubr.bf16.mxu0 %v3172_v9 }
  0xd5   :  { %973 = vmatmul.mubr.bf16.gmra.mrb[64].mxu0 %v3175_v10 }
  0xd6   :  { %980 = vmatprep.mubr.bf16.mxu0 %v3176_v11 }
  0xdd   :  { %981 = vmatmul.mubr.bf16.gmra.mrb[68].mxu0 %v3178_v12 }
  0xde   :  { %988 = vmatprep.mubr.bf16.mxu0 %v3180_v13 }
  0xe5   :  { %989 = vmatmul.mubr.bf16.gmra.mrb[72].mxu0 %v3183_v14 }
  0xe6   :  { %996 = vmatprep.mubr.bf16.mxu0 %v3184_v15 }
  0xed   :  { %997 = vmatmul.mubr.bf16.gmra.mrb[76].mxu0 %v3186_v17 }
  0xee   :  { %1004 = vmatprep.mubr.bf16.mxu0 %v3188_v18 }
  0xf5   :  { %1005 = vmatmul.mubr.bf16.gmra.mrb[80].mxu0 %v3191_v19 }
  0xf6   :  { %1012 = vmatprep.mubr.bf16.mxu0 %v3192_v20 }
  0xfd   :  { %1013 = vmatmul.mubr.bf16.gmra.mrb[84].mxu0 %v3194_v21 }
  0xfe   :  { %1020 = vmatprep.mubr.bf16.mxu0 %v3196_v22 }
 0x105   :  { %1021 = vmatmul.mubr.bf16.gmra.mrb[88].mxu0 %v3199_v23 }
 0x106   :  { %1028 = vmatprep.mubr.bf16.mxu0 %v3200_v24 }
 0x10b   :  { %v3534_v31 = vpop.f32.mrb[0].mxu1 }
 0x10c   :  { %v3536_v32 = vpop.f32.mrb[1].mxu1 }
 0x10d   :  { %1029 = vmatmul.mubr.bf16.gmra.mrb[92].mxu0 %v3202_v25  ;;  %v3538_v33 = vpop.f32.mrb[2].mxu1 }
 0x10e   :  { %2902 = vmatprep.mubr.bf16.mxu0 %v3203_v26  ;;  %v3540_v34 = vpop.f32.mrb[3].mxu1 }
 0x113   :  { %v3542_v37 = vpop.f32.mrb[4].mxu1 }
 0x114   :  { %v3544_v38 = vpop.f32.mrb[5].mxu1 }
 0x115   :  { %2903 = vmatmul.mubr.bf16.vlgmr.msra.gmra.mrb[96].mxu0 %v3204_v27  ;;  %v3546_v39 = vpop.f32.mrb[6].mxu1 }
 0x116   :  { %2906 = vmatprep.mubr.bf16.mxu0 %v3205_v28  ;;  %v3548_v40 = vpop.f32.mrb[7].mxu1 }
 0x11b   :  { %v3554_v46 = vpop.f32.mrb[8].mxu1 }
 0x11c   :  { %v3556_v47 = vpop.f32.mrb[9].mxu1 }
 0x11d   :  { %2907 = vmatmul.mubr.bf16.gmra.mrb[100].mxu0 %v3206_v29  ;;  %v3558_v48 = vpop.f32.mrb[10].mxu1 }
 0x11e   :  { %2910 = vmatprep.mubr.bf16.mxu0 %v3207_v30  ;;  %v3560_v49 = vpop.f32.mrb[11].mxu1 }
 0x123   :  { %v3566_v54 = vpop.f32.mrb[12].mxu1 }
 0x124   :  { %v3568_v55 = vpop.f32.mrb[13].mxu1 }
 0x125   :  { %2911 = vmatmul.mubr.bf16.gmra.mrb[104].mxu0 %v3208_v35  ;;  %v3570_v56 = vpop.f32.mrb[14].mxu1 }
 0x126   :  { %2914 = vmatprep.mubr.bf16.mxu0 %v3209_v36  ;;  %v3572_v57 = vpop.f32.mrb[15].mxu1 }
 0x128   :  { %v3550_v41 = vpop.f32.mrb[0].mxu0 }
 0x129   :  { %v848_v42 = vpop.f32.mrb[1].mxu0 }
 0x12a   :  { %v3552_v44 = vpop.f32.mrb[2].mxu0 }
 0x12b   :  { %v851_v45 = vpop.f32.mrb[3].mxu0  ;;  %v3578_v62 = vpop.f32.mrb[16].mxu1 }
 0x12c   :  { %v3580_v63 = vpop.f32.mrb[17].mxu1 }
 0x12d   :  { %2915 = vmatmul.mubr.bf16.gmra.mrb[108].mxu0 %v3210_v43  ;;  %v3582_v0 = vpop.f32.mrb[18].mxu1 }
 0x12e   :  { %v3584_v1 = vpop.f32.mrb[19].mxu1 }
 0x130   :  { %v3562_v50 = vpop.f32.mrb[4].mxu0 }
 0x131   :  { %v856_v51 = vpop.f32.mrb[5].mxu0 }
 0x132   :  { %v3564_v52 = vpop.f32.mrb[6].mxu0  ;;  %v108_v51 = vld [vmem:[#allocation2 + $0x80] sm:$0xff] }
 0x133   :  { %v859_v53 = vpop.f32.mrb[7].mxu0  ;;  %v3593_v7 = vpop.f32.mrb[20].mxu1 }
 0x134   :  { %v3595_v8 = vpop.f32.mrb[21].mxu1 }
 0x135   :  { %v3597_v9 = vpop.f32.mrb[22].mxu1 }
 0x136   :  { %v3599_v10 = vpop.f32.mrb[23].mxu1 }
 0x138   :  { %v3574_v58 = vpop.f32.mrb[8].mxu0 }
 0x139   :  { %v864_v59 = vpop.f32.mrb[9].mxu0 }
 0x13a   :  { %v3576_v60 = vpop.f32.mrb[10].mxu0 }
 0x13b   :  { %v867_v61 = vpop.f32.mrb[11].mxu0  ;;  %v3605_v15 = vpop.f32.mrb[24].mxu1 }
 0x13c   :  { %v3607_v16 = vpop.f32.mrb[25].mxu1 }
 0x13d   :  { %v3609_v17 = vpop.f32.mrb[26].mxu1 }
 0x13e   :  { %v3611_v18 = vpop.f32.mrb[27].mxu1 }
 0x140   :  { %v3589_v3 = vpop.f32.mrb[12].mxu0 }
 0x141   :  { %v872_v4 = vpop.f32.mrb[13].mxu0 }
 0x142   :  { %v3591_v5 = vpop.f32.mrb[14].mxu0 }
 0x143   :  { %v875_v6 = vpop.f32.mrb[15].mxu0  ;;  %v3617_v23 = vpop.f32.mrb[28].mxu1 }
 0x144   :  { %v3621_v25 = vpop.f32.mrb[29].mxu1 }
 0x145   :  { %v3623_v27 = vpop.f32.mrb[30].mxu1 }
 0x146   :  { %v3627_v29 = vpop.f32.mrb[31].mxu1 }
 0x148   :  { %v3601_v11 = vpop.f32.mrb[16].mxu0 }
 0x149   :  { %v880_v12 = vpop.f32.mrb[17].mxu0 }
 0x14a   :  { %v3603_v13 = vpop.f32.mrb[18].mxu0 }
 0x14b   :  { %v883_v14 = vpop.f32.mrb[19].mxu0 }
 0x150   :  { %v3613_v19 = vpop.f32.mrb[20].mxu0 }
 0x151   :  { %v888_v20 = vpop.f32.mrb[21].mxu0 }
 0x152   :  { %v3615_v21 = vpop.f32.mrb[22].mxu0  ;;  %v110_v20 = vld [vmem:[#allocation2 + $0x90] sm:$0xff] }
 0x153   :  { %v891_v22 = vpop.f32.mrb[23].mxu0 }
 0x158   :  { %v3619_v24 = vpop.f32.mrb[24].mxu0 }
 0x159   :  { %v896_v26 = vpop.f32.mrb[25].mxu0 }
 0x15a   :  { %v3625_v28 = vpop.f32.mrb[26].mxu0 }
 0x15b   :  { %v899_v30 = vpop.f32.mrb[27].mxu0 }
 0x160   :  { %v3629_v35 = vpop.f32.mrb[28].mxu0 }
 0x161   :  { %v904_v36 = vpop.f32.mrb[29].mxu0 }
 0x162   :  { %v3631_v42 = vpop.f32.mrb[30].mxu0  ;;  %v111_v36 = vld [vmem:[#allocation2 + $0x98] sm:$0xff] }
 0x163   :  { %v907_v43 = vpop.f32.mrb[31].mxu0 }
 0x168   :  { %v910_v45 = vpop.f32.mrb[32].mxu0 }
 0x169   :  { %v1136_v53 = vadd.f32 %v3536_v32, %v910_v45  ;;  %v912_v59 = vpop.f32.mrb[33].mxu0 }
 0x16a   :  { %v913_v61 = vpop.f32.mrb[34].mxu0 }
 0x16b   :  { %v1278_v4 = vadd.f32 %v1136_v53, %v108_v51  ;;  %v1139_v6 = vadd.f32 %v3540_v34, %v913_v61  ;;  %v915_v12 = vpop.f32.mrb[35].mxu0  ;;  %v112_v53 = vld [vmem:[#allocation2 + $0xa0] sm:$0xff] }
 0x16d   :  { %1327 = vst.msk [vmem:[#allocation2 + $0x80] sm:$0xff] %vm43_vm0, %v1278_v4  ;;  %v1279_v14 = vadd.f32 %v1139_v6, %v109_v2  ;;  %v113_v6 = vld [vmem:[#allocation2 + $0xa8] sm:$0xff] }
 0x16f   :  { %1328 = vst.msk [vmem:[#allocation2 + $0x88] sm:$0xff] %vm43_vm0, %v1279_v14 }
 0x170   :  { %v918_v22 = vpop.f32.mrb[36].mxu0 }
 0x171   :  { %v1144_v26 = vadd.f32 %v3534_v31, %v918_v22  ;;  %v920_v30 = vpop.f32.mrb[37].mxu0 }
 0x172   :  { %v921_v43 = vpop.f32.mrb[38].mxu0 }
 0x173   :  { %v1280_v32 = vadd.f32 %v1144_v26, %v110_v20  ;;  %v1147_v45 = vadd.f32 %v3538_v33, %v921_v43  ;;  %v923_v59 = vpop.f32.mrb[39].mxu0  ;;  %v114_v20 = vld [vmem:[#allocation2 + $0xb0] sm:$0xff] }
 0x175   :  { %1329 = vst.msk [vmem:[#allocation2 + $0x90] sm:$0xff] %vm43_vm0, %v1280_v32  ;;  %v1281_v34 = vadd.f32 %v1147_v45, %v111_v36  ;;  %v115_v36 = vld [vmem:[#allocation2 + $0xb8] sm:$0xff] }
 0x177   :  { %1330 = vst.msk [vmem:[#allocation2 + $0x98] sm:$0xff] %vm43_vm0, %v1281_v34  ;;  %v116_v34 = vld [vmem:[#allocation2 + $0xc0] sm:$0xff] }
 0x178   :  { %v926_v51 = vpop.f32.mrb[40].mxu0 }
 0x179   :  { %v1152_v61 = vadd.f32 %v3544_v38, %v926_v51  ;;  %v928_v2 = vpop.f32.mrb[41].mxu0 }
 0x17a   :  { %v929_v4 = vpop.f32.mrb[42].mxu0  ;;  %v117_v2 = vld [vmem:[#allocation2 + $0xc8] sm:$0xff] }
 0x17b   :  { %v1282_v31 = vadd.f32 %v1152_v61, %v112_v53  ;;  %v1155_v12 = vadd.f32 %v3548_v40, %v929_v4  ;;  %v931_v14 = vpop.f32.mrb[43].mxu0 }
 0x17d   :  { %1331 = vst.msk [vmem:[#allocation2 + $0xa0] sm:$0xff] %vm43_vm0, %v1282_v31  ;;  %v1283_v33 = vadd.f32 %v1155_v12, %v113_v6  ;;  %v118_v31 = vld [vmem:[#allocation2 + $0xd0] sm:$0xff] }
 0x17f   :  { %1332 = vst.msk [vmem:[#allocation2 + $0xa8] sm:$0xff] %vm43_vm0, %v1283_v33 }
 0x180   :  { %v934_v22 = vpop.f32.mrb[44].mxu0 }
 0x181   :  { %v1160_v26 = vadd.f32 %v3542_v37, %v934_v22  ;;  %v936_v30 = vpop.f32.mrb[45].mxu0 }
 0x182   :  { %v937_v43 = vpop.f32.mrb[46].mxu0 }
 0x183   :  { %v1284_v38 = vadd.f32 %v1160_v26, %v114_v20  ;;  %v1163_v32 = vadd.f32 %v3546_v39, %v937_v43  ;;  %v939_v45 = vpop.f32.mrb[47].mxu0  ;;  %v119_v20 = vld [vmem:[#allocation2 + $0xd8] sm:$0xff]  ;;  %v120_v43 = vld [vmem:[#allocation2 + $0xe0] sm:$0xff] }
 0x185   :  { %1333 = vst.msk [vmem:[#allocation2 + $0xb0] sm:$0xff] %vm43_vm0, %v1284_v38  ;;  %v1285_v40 = vadd.f32 %v1163_v32, %v115_v36 }
 0x187   :  { %1334 = vst.msk [vmem:[#allocation2 + $0xb8] sm:$0xff] %vm43_vm0, %v1285_v40  ;;  %v121_v40 = vld [vmem:[#allocation2 + $0xe8] sm:$0xff] }
 0x188   :  { %v942_v59 = vpop.f32.mrb[48].mxu0 }
 0x189   :  { %v1168_v51 = vadd.f32 %v3556_v47, %v942_v59  ;;  %v944_v53 = vpop.f32.mrb[49].mxu0 }
 0x18a   :  { %v945_v61 = vpop.f32.mrb[50].mxu0 }
 0x18b   :  { %v1286_v37 = vadd.f32 %v1168_v51, %v116_v34  ;;  %v1171_v4 = vadd.f32 %v3560_v49, %v945_v61  ;;  %v947_v6 = vpop.f32.mrb[51].mxu0  ;;  %v122_v51 = vld [vmem:[#allocation2 + $0xf0] sm:$0xff] }
 0x18d   :  { %1335 = vst.msk [vmem:[#allocation2 + $0xc0] sm:$0xff] %vm43_vm0, %v1286_v37  ;;  %v1287_v39 = vadd.f32 %v1171_v4, %v117_v2  ;;  %v123_v37 = vld [vmem:[#allocation2 + $0xf8] sm:$0xff] }
 0x18f   :  { %1336 = vst.msk [vmem:[#allocation2 + $0xc8] sm:$0xff] %vm43_vm0, %v1287_v39 }
 0x190   :  { %v950_v12 = vpop.f32.mrb[52].mxu0 }
 0x191   :  { %v1176_v14 = vadd.f32 %v3554_v46, %v950_v12  ;;  %v952_v33 = vpop.f32.mrb[53].mxu0  ;;  %v124_v12 = vld [vmem:[#allocation2 + $0x100] sm:$0xff] }
 0x192   :  { %v953_v22 = vpop.f32.mrb[54].mxu0 }
 0x193   :  { %v1288_v47 = vadd.f32 %v1176_v14, %v118_v31  ;;  %v1179_v26 = vadd.f32 %v3558_v48, %v953_v22  ;;  %v955_v30 = vpop.f32.mrb[55].mxu0  ;;  %v125_v22 = vld [vmem:[#allocation2 + $0x108] sm:$0xff] }
 0x194   :  { %v126_v30 = vld [vmem:[#allocation2 + $0x110] sm:$0xff] }
 0x195   :  { %1337 = vst.msk [vmem:[#allocation2 + $0xd0] sm:$0xff] %vm43_vm0, %v1288_v47  ;;  %v1289_v49 = vadd.f32 %v1179_v26, %v119_v20 }
 0x197   :  { %1338 = vst.msk [vmem:[#allocation2 + $0xd8] sm:$0xff] %vm43_vm0, %v1289_v49 }
 0x198   :  { %v958_v36 = vpop.f32.mrb[56].mxu0 }
 0x199   :  { %v1184_v38 = vadd.f32 %v3568_v55, %v958_v36  ;;  %v960_v32 = vpop.f32.mrb[57].mxu0 }
 0x19a   :  { %v961_v45 = vpop.f32.mrb[58].mxu0 }
 0x19b   :  { %v1290_v46 = vadd.f32 %v1184_v38, %v120_v43  ;;  %v1187_v59 = vadd.f32 %v3572_v57, %v961_v45  ;;  %v963_v34 = vpop.f32.mrb[59].mxu0  ;;  %v127_v38 = vld [vmem:[#allocation2 + $0x118] sm:$0xff] }
 0x19d   :  { %1339 = vst.msk [vmem:[#allocation2 + $0xe0] sm:$0xff] %vm43_vm0, %v1290_v46  ;;  %v1291_v48 = vadd.f32 %v1187_v59, %v121_v40  ;;  %v128_v59 = vld [vmem:[#allocation2 + $0x120] sm:$0xff] }
 0x19f   :  { %1340 = vst.msk [vmem:[#allocation2 + $0xe8] sm:$0xff] %vm43_vm0, %v1291_v48 }
 0x1a0   :  { %v966_v53 = vpop.f32.mrb[60].mxu0 }
 0x1a1   :  { %v1192_v61 = vadd.f32 %v3566_v54, %v966_v53  ;;  %v968_v2 = vpop.f32.mrb[61].mxu0  ;;  %v129_v53 = vld [vmem:[#allocation2 + $0x128] sm:$0xff] }
 0x1a2   :  { %v969_v4 = vpop.f32.mrb[62].mxu0 }
 0x1a3   :  { %v1292_v55 = vadd.f32 %v1192_v61, %v122_v51  ;;  %v1195_v6 = vadd.f32 %v3570_v56, %v969_v4  ;;  %v971_v39 = vpop.f32.mrb[63].mxu0 }
 0x1a4   :  { %v131_v39 = vld [vmem:[#allocation2 + $0x138] sm:$0xff] }
 0x1a5   :  { %1341 = vst.msk [vmem:[#allocation2 + $0xf0] sm:$0xff] %vm43_vm0, %v1292_v55  ;;  %v1293_v57 = vadd.f32 %v1195_v6, %v123_v37  ;;  %v130_v37 = vld [vmem:[#allocation2 + $0x130] sm:$0xff] }
 0x1a7   :  { %1342 = vst.msk [vmem:[#allocation2 + $0xf8] sm:$0xff] %vm43_vm0, %v1293_v57 }
 0x1a8   :  { %v974_v31 = vpop.f32.mrb[64].mxu0 }
 0x1a9   :  { %v1200_v14 = vadd.f32 %v3580_v63, %v974_v31  ;;  %v976_v33 = vpop.f32.mrb[65].mxu0 }
 0x1aa   :  { %v977_v20 = vpop.f32.mrb[66].mxu0  ;;  %v132_v33 = vld [vmem:[#allocation2 + $0x140] sm:$0xff] }
 0x1ab   :  { %v1294_v54 = vadd.f32 %v1200_v14, %v124_v12  ;;  %v1203_v47 = vadd.f32 %v3584_v1, %v977_v20  ;;  %v979_v26 = vpop.f32.mrb[67].mxu0 }
 0x1ad   :  { %1343 = vst.msk [vmem:[#allocation2 + $0x100] sm:$0xff] %vm43_vm0, %v1294_v54  ;;  %v1295_v56 = vadd.f32 %v1203_v47, %v125_v22  ;;  %v133_v47 = vld [vmem:[#allocation2 + $0x148] sm:$0xff] }
 0x1af   :  { %1344 = vst.msk [vmem:[#allocation2 + $0x108] sm:$0xff] %vm43_vm0, %v1295_v56 }
 0x1b0   :  { %v982_v49 = vpop.f32.mrb[68].mxu0 }
 0x1b1   :  { %v1208_v36 = vadd.f32 %v3578_v62, %v982_v49  ;;  %v984_v43 = vpop.f32.mrb[69].mxu0 }
 0x1b2   :  { %v985_v32 = vpop.f32.mrb[70].mxu0 }
 0x1b3   :  { %v1296_v63 = vadd.f32 %v1208_v36, %v126_v30  ;;  %v1211_v45 = vadd.f32 %v3582_v0, %v985_v32  ;;  %v987_v40 = vpop.f32.mrb[71].mxu0  ;;  %v134_v30 = vld [vmem:[#allocation2 + $0x150] sm:$0xff] }
 0x1b5   :  { %1345 = vst.msk [vmem:[#allocation2 + $0x110] sm:$0xff] %vm43_vm0, %v1296_v63  ;;  %v1297_v1 = vadd.f32 %v1211_v45, %v127_v38  ;;  %v135_v38 = vld [vmem:[#allocation2 + $0x158] sm:$0xff] }
 0x1b7   :  { %1346 = vst.msk [vmem:[#allocation2 + $0x118] sm:$0xff] %vm43_vm0, %v1297_v1  ;;  %v136_v1 = vld [vmem:[#allocation2 + $0x160] sm:$0xff] }
 0x1b8   :  { %v990_v46 = vpop.f32.mrb[72].mxu0 }
 0x1b9   :  { %v1216_v34 = vadd.f32 %v3595_v8, %v990_v46  ;;  %v992_v48 = vpop.f32.mrb[73].mxu0 }
 0x1ba   :  { %v993_v51 = vpop.f32.mrb[74].mxu0 }
 0x1bb   :  { %v1298_v62 = vadd.f32 %v1216_v34, %v128_v59  ;;  %v1219_v61 = vadd.f32 %v3599_v10, %v993_v51  ;;  %v995_v2 = vpop.f32.mrb[75].mxu0 }
 0x1bd   :  { %1347 = vst.msk [vmem:[#allocation2 + $0x120] sm:$0xff] %vm43_vm0, %v1298_v62  ;;  %v1299_v0 = vadd.f32 %v1219_v61, %v129_v53  ;;  %v138_v61 = vld [vmem:[#allocation2 + $0x170] sm:$0xff] }
 0x1bf   :  { %1348 = vst.msk [vmem:[#allocation2 + $0x128] sm:$0xff] %vm43_vm0, %v1299_v0 }
 0x1c0   :  { %v998_v4 = vpop.f32.mrb[76].mxu0 }
 0x1c1   :  { %v1224_v55 = vadd.f32 %v3593_v7, %v998_v4  ;;  %v1000_v6 = vpop.f32.mrb[77].mxu0  ;;  %v139_v4 = vld [vmem:[#allocation2 + $0x178] sm:$0xff] }
 0x1c2   :  { %v1001_v57 = vpop.f32.mrb[78].mxu0 }
 0x1c3   :  { %v1300_v8 = vadd.f32 %v1224_v55, %v130_v37  ;;  %v1227_v31 = vadd.f32 %v3597_v9, %v1001_v57  ;;  %v1003_v12 = vpop.f32.mrb[79].mxu0  ;;  %v94_v57 = vld [vmem:[#allocation2 + $0x10] sm:$0xff] }
 0x1c4   :  { %v92_v12 = vld [vmem:[#allocation2] sm:$0xff] }
 0x1c5   :  { %1349 = vst.msk [vmem:[#allocation2 + $0x130] sm:$0xff] %vm43_vm0, %v1300_v8  ;;  %v1301_v10 = vadd.f32 %v1227_v31, %v131_v39 }
 0x1c7   :  { %1350 = vst.msk [vmem:[#allocation2 + $0x138] sm:$0xff] %vm43_vm0, %v1301_v10 }
 0x1c8   :  { %v1006_v14 = vpop.f32.mrb[80].mxu0 }
 0x1c9   :  { %v1232_v20 = vadd.f32 %v3607_v16, %v1006_v14  ;;  %v1008_v22 = vpop.f32.mrb[81].mxu0  ;;  %v95_v14 = vld [vmem:[#allocation2 + $0x18] sm:$0xff] }
 0x1ca   :  { %v1009_v54 = vpop.f32.mrb[82].mxu0 }
 0x1cb   :  { %v1302_v7 = vadd.f32 %v1232_v20, %v132_v33  ;;  %v1235_v26 = vadd.f32 %v3611_v18, %v1009_v54  ;;  %v1011_v56 = vpop.f32.mrb[83].mxu0  ;;  %v3690_v18 = vld [vmem:[%s3862_s4] sm:$0xff]  }
 0x1cc   :  { %3000 = vmatprep.subr.bf16.mxu1 %v3690_v18 }
 0x1cd   :  { %1351 = vst.msk [vmem:[#allocation2 + $0x140] sm:$0xff] %vm43_vm0, %v1302_v7  ;;  %v1303_v9 = vadd.f32 %v1235_v26, %v133_v47 }
 0x1cf   :  { %1352 = vst.msk [vmem:[#allocation2 + $0x148] sm:$0xff] %vm43_vm0, %v1303_v9 }
 0x1d0   :  { %v1014_v49 = vpop.f32.mrb[84].mxu0 }
 0x1d1   :  { %v1240_v36 = vadd.f32 %v3605_v15, %v1014_v49  ;;  %v1016_v43 = vpop.f32.mrb[85].mxu0 }
 0x1d2   :  { %v1017_v32 = vpop.f32.mrb[86].mxu0 }
 0x1d3   :  { %v1304_v16 = vadd.f32 %v1240_v36, %v134_v30  ;;  %v1243_v63 = vadd.f32 %v3609_v17, %v1017_v32  ;;  %v1019_v45 = vpop.f32.mrb[87].mxu0  ;;  %v137_v17 = vld [vmem:[#allocation2 + $0x168] sm:$0xff]  ;;  %v99_v36 = vld [vmem:[#allocation2 + $0x38] sm:$0xff] }
 0x1d4   :  { %v97_v32 = vld [vmem:[#allocation2 + $0x28] sm:$0xff] }
 0x1d5   :  { %1353 = vst.msk [vmem:[#allocation2 + $0x150] sm:$0xff] %vm43_vm0, %v1304_v16  ;;  %v1305_v40 = vadd.f32 %v1243_v63, %v135_v38 }
 0x1d7   :  { %1354 = vst.msk [vmem:[#allocation2 + $0x158] sm:$0xff] %vm43_vm0, %v1305_v40 }
 0x1d8   :  { %v1022_v15 = vpop.f32.mrb[88].mxu0 }
 0x1d9   :  { %v1248_v46 = vadd.f32 %v3621_v25, %v1022_v15  ;;  %v1024_v59 = vpop.f32.mrb[89].mxu0 }
 0x1da   :  { %v1025_v34 = vpop.f32.mrb[90].mxu0 }
 0x1db   :  { %v1306_v48 = vadd.f32 %v1248_v46, %v136_v1  ;;  %v1251_v51 = vadd.f32 %v3627_v29, %v1025_v34  ;;  %v1027_v53 = vpop.f32.mrb[91].mxu0  ;;  %v102_v46 = vld [vmem:[#allocation2 + $0x50] sm:$0xff] }
 0x1dc   :  { %v3213_v53 = vld [vmem:[%s3862_s4 + $0x8] sm:$0xff]  }
 0x1dd   :  { %1355 = vst.msk [vmem:[#allocation2 + $0x160] sm:$0xff] %vm43_vm0, %v1306_v48  ;;  %v1307_v62 = vadd.f32 %v1251_v51, %v137_v17 }
 0x1df   :  { %1356 = vst.msk [vmem:[#allocation2 + $0x168] sm:$0xff] %vm43_vm0, %v1307_v62 }
 0x1e0   :  { %v1030_v2 = vpop.f32.mrb[92].mxu0 }
 0x1e1   :  { %v1256_v0 = vadd.f32 %v3617_v23, %v1030_v2  ;;  %v1032_v37 = vpop.f32.mrb[93].mxu0 }
 0x1e2   :  { %v1033_v55 = vpop.f32.mrb[94].mxu0 }
 0x1e3   :  { %v1308_v25 = vadd.f32 %v1256_v0, %v138_v61  ;;  %v1259_v6 = vadd.f32 %v3623_v27, %v1033_v55  ;;  %v1035_v39 = vpop.f32.mrb[95].mxu0  ;;  %v93_v27 = vld [vmem:[#allocation2 + $0x8] sm:$0xff]  ;;  %v103_v61 = vld [vmem:[#allocation2 + $0x58] sm:$0xff] }
 0x1e5   :  { %1357 = vst.msk [vmem:[#allocation2 + $0x170] sm:$0xff] %vm43_vm0, %v1308_v25  ;;  %v1309_v29 = vadd.f32 %v1259_v6, %v139_v4  ;;  %v101_v4 = vld [vmem:[#allocation2 + $0x48] sm:$0xff] }
 0x1e7   :  { %1358 = vst.msk [vmem:[#allocation2 + $0x178] sm:$0xff] %vm43_vm0, %v1309_v29 }
 0x1e8   :  { %v2904_v8 = vpop.f32.mrb[96].mxu0 }
 0x1e9   :  { %v1080_v31 = vadd.f32 %v2904_v8, %v3562_v50  ;;  %v1071_v10 = vpop.f32.mrb[97].mxu0 }
 0x1ea   :  { %v1072_v23 = vadd.f32 %v1071_v10, %v3550_v41  ;;  %v2905_v33 = vpop.f32.mrb[98].mxu0  ;;  %v98_v41 = vld [vmem:[#allocation2 + $0x30] sm:$0xff]  ;;  %v104_v10 = vld [vmem:[#allocation2 + $0x60] sm:$0xff] }
 0x1eb   :  { %v1264_v20 = vadd.f32 %v1080_v31, %v94_v57  ;;  %v1083_v22 = vadd.f32 %v2905_v33, %v3564_v52  ;;  %v1074_v54 = vpop.f32.mrb[99].mxu0  ;;  %v96_v52 = vld [vmem:[#allocation2 + $0x20] sm:$0xff]  ;;  %v3215_v33 = vld [vmem:[%s3862_s4 + $0x18] sm:$0xff]  }
 0x1ec   :  { %v1262_v47 = vadd.f32 %v1072_v23, %v92_v12  ;;  %v1075_v7 = vadd.f32 %v1074_v54, %v3552_v44 }
 0x1ed   :  { %1313 = vst.msk [vmem:[#allocation2 + $0x10] sm:$0xff] %vm43_vm0, %v1264_v20  ;;  %v1265_v26 = vadd.f32 %v1083_v22, %v95_v14  ;;  %v107_v22 = vld [vmem:[#allocation2 + $0x78] sm:$0xff] }
 0x1ee   :  { %1311 = vst.msk [vmem:[#allocation2] sm:$0xff] %vm43_vm0, %v1262_v47  ;;  %v1263_v50 = vadd.f32 %v1075_v7, %v93_v27  ;;  %v105_v7 = vld [vmem:[#allocation2 + $0x68] sm:$0xff] }
 0x1ef   :  { %1314 = vst.msk [vmem:[#allocation2 + $0x18] sm:$0xff] %vm43_vm0, %v1265_v26 }
 0x1f0   :  { %1312 = vst.msk [vmem:[#allocation2 + $0x8] sm:$0xff] %vm43_vm0, %v1263_v50  ;;  %v2908_v56 = vpop.f32.mrb[100].mxu0 }
 0x1f1   :  { %v1096_v9 = vadd.f32 %v2908_v56, %v3589_v3  ;;  %v1087_v30 = vpop.f32.mrb[101].mxu0 }
 0x1f2   :  { %v1088_v49 = vadd.f32 %v1087_v30, %v3574_v58  ;;  %v2909_v44 = vpop.f32.mrb[102].mxu0 }
 0x1f3   :  { %v1268_v43 = vadd.f32 %v1096_v9, %v98_v41  ;;  %v1099_v38 = vadd.f32 %v2909_v44, %v3591_v5  ;;  %v1090_v16 = vpop.f32.mrb[103].mxu0  ;;  %v3218_v44 = vld [vmem:[%s3862_s4 + $0x30] sm:$0xff]  }
 0x1f4   :  { %v1266_v63 = vadd.f32 %v1088_v49, %v96_v52  ;;  %v1091_v45 = vadd.f32 %v1090_v16, %v3576_v60  ;;  %v1364_v34 = vld [vmem:[#allocation2 + $0x10] sm:$0xff]  ;;  %v100_v60 = vld [vmem:[#allocation2 + $0x40] sm:$0xff]  ;;  %v1379_v16 = vld [vmem:[#allocation2 + $0x88] sm:$0xff] }
 0x1f5   :  { %1317 = vst.msk [vmem:[#allocation2 + $0x30] sm:$0xff] %vm43_vm0, %v1268_v43  ;;  %v1269_v40 = vadd.f32 %v1099_v38, %v99_v36  ;;  %v1362_v58 = vld [vmem:[#allocation2] sm:$0xff]  ;;  %v3217_v36 = vld [vmem:[%s3862_s4 + $0x28] sm:$0xff]  }
 0x1f6   :  { %1315 = vst.msk [vmem:[#allocation2 + $0x20] sm:$0xff] %vm43_vm0, %v1266_v63  ;;  %v1267_v3 = vadd.f32 %v1091_v45, %v97_v32  ;;  %v1365_v15 = vld [vmem:[#allocation2 + $0x18] sm:$0xff] }
 0x1f7   :  { %1318 = vst.msk [vmem:[#allocation2 + $0x38] sm:$0xff] %vm43_vm0, %v1269_v40  ;;  %v1363_v1 = vld [vmem:[#allocation2 + $0x8] sm:$0xff]  ;;  %v1411_v51 = vpack.c.bf16 %v1365_v15, %v1364_v34  ;;  %v3219_v15 = vld [vmem:[%s3862_s4 + $0x38] sm:$0xff]   ;;  %v1382_v34 = vld [vmem:[#allocation2 + $0xa0] sm:$0xff] }
 0x1f8   :  { %1316 = vst.msk [vmem:[#allocation2 + $0x28] sm:$0xff] %vm43_vm0, %v1267_v3  ;;  %v2912_v5 = vpop.f32.mrb[104].mxu0  ;;  %v1410_v59 = vpack.c.bf16 %v1363_v1, %v1362_v58  ;;  %v1378_v3 = vld [vmem:[#allocation2 + $0x80] sm:$0xff]  ;;  %v1381_v1 = vld [vmem:[#allocation2 + $0x98] sm:$0xff] }
 0x1f9   :  { %v1112_v17 = vadd.f32 %v2912_v5, %v3613_v19  ;;  %v1103_v48 = vpop.f32.mrb[105].mxu0  ;;  %v1418_v58 = vpack.c.bf16 %v1379_v16, %v1378_v3  ;;  %v1380_v5 = vld [vmem:[#allocation2 + $0x90] sm:$0xff] }
 0x1fa   :  { %v1104_v62 = vadd.f32 %v1103_v48, %v3601_v11  ;;  %v2913_v2 = vpop.f32.mrb[106].mxu0  ;;  %2952 = vmatprep.mubr.msk.bf16.mxu1 %vm43_vm0, %v1410_v59  ;;  %v3214_v11 = vld [vmem:[%s3862_s4 + $0x10] sm:$0xff]   ;;  %v1419_v59 = vpack.c.bf16 %v1381_v1, %v1380_v5  ;;  %v1387_v48 = vld [vmem:[#allocation2 + $0xc8] sm:$0xff] }
 0x1fb   :  { %v1272_v0 = vadd.f32 %v1112_v17, %v102_v46  ;;  %v1115_v37 = vadd.f32 %v2913_v2, %v3615_v21  ;;  %v1106_v55 = vpop.f32.mrb[107].mxu0  ;;  %2953 = vmatmul.mubr.msk.bf16.vlgmr.msra.gmra.mrb[32].mxu1 %vm43_vm0, %v1411_v51  ;;  %v1383_v46 = vld [vmem:[#allocation2 + $0xa8] sm:$0xff]  ;;  %v1384_v51 = vld [vmem:[#allocation2 + $0xb0] sm:$0xff]  ;;  %v1389_v2 = vld [vmem:[#allocation2 + $0xd8] sm:$0xff] }
 0x1fc   :  { %v1270_v19 = vadd.f32 %v1104_v62, %v100_v60  ;;  %v1107_v25 = vadd.f32 %v1106_v55, %v3603_v13  ;;  %3001 = vmatpush3.bf16.msra.mxu1 %v3690_v18  ;;  %v106_v13 = vld [vmem:[#allocation2 + $0x70] sm:$0xff]  ;;  %v1420_v17 = vpack.c.bf16 %v1383_v46, %v1382_v34  ;;  %v1385_v60 = vld [vmem:[#allocation2 + $0xb8] sm:$0xff]  ;;  %v1386_v62 = vld [vmem:[#allocation2 + $0xc0] sm:$0xff] }
 0x1fd   :  { %1321 = vst.msk [vmem:[#allocation2 + $0x50] sm:$0xff] %vm43_vm0, %v1272_v0  ;;  %v1273_v6 = vadd.f32 %v1115_v37, %v103_v61  ;;  %3002 = vmatprep.subr.bf16.mxu1 %v3213_v53  ;;  %v1366_v29 = vld [vmem:[#allocation2 + $0x20] sm:$0xff]  ;;  %v1368_v31 = vld [vmem:[#allocation2 + $0x30] sm:$0xff]  ;;  %v1422_v61 = vpack.c.bf16 %v1387_v48, %v1386_v62  ;;  %v1391_v0 = vld [vmem:[#allocation2 + $0xe8] sm:$0xff] }
 0x1fe   :  { %1319 = vst.msk [vmem:[#allocation2 + $0x40] sm:$0xff] %vm43_vm0, %v1270_v19  ;;  %v1271_v21 = vadd.f32 %v1107_v25, %v101_v4  ;;  %v1369_v39 = vld [vmem:[#allocation2 + $0x38] sm:$0xff]  ;;  %v1388_v37 = vld [vmem:[#allocation2 + $0xd0] sm:$0xff]  ;;  %v1390_v55 = vld [vmem:[#allocation2 + $0xe0] sm:$0xff] }
 0x1ff   :  { %1322 = vst.msk [vmem:[#allocation2 + $0x58] sm:$0xff] %vm43_vm0, %v1273_v6  ;;  %v1367_v57 = vld [vmem:[#allocation2 + $0x28] sm:$0xff]  ;;  %v1413_v14 = vpack.c.bf16 %v1369_v39, %v1368_v31  ;;  %v1423_v4 = vpack.c.bf16 %v1389_v2, %v1388_v37  ;;  %v1424_v19 = vpack.c.bf16 %v1391_v0, %v1390_v55  ;;  %v1393_v25 = vld [vmem:[#allocation2 + $0xf8] sm:$0xff]  ;;  %v1394_v39 = vld [vmem:[#allocation2 + $0x100] sm:$0xff] }
 0x200   :  { %1320 = vst.msk [vmem:[#allocation2 + $0x48] sm:$0xff] %vm43_vm0, %v1271_v21  ;;  %v2916_v18 = vpop.f32.mrb[108].mxu0  ;;  %v1412_v8 = vpack.c.bf16 %v1367_v57, %v1366_v29  ;;  %3003 = vmatpush3.bf16.msra.mxu1 %v3213_v53  ;;  %v1421_v53 = vpack.c.bf16 %v1385_v60, %v1384_v51  ;;  %v1395_v6 = vld [vmem:[#allocation2 + $0x108] sm:$0xff]  ;;  %v1397_v57 = vld [vmem:[#allocation2 + $0x118] sm:$0xff]  ;;  %v1398_v31 = vld [vmem:[#allocation2 + $0x120] sm:$0xff] }
 0x201   :  { %v1128_v12 = vadd.f32 %v2916_v18, %v3629_v35  ;;  %v1119_v23 = vpop.f32.mrb[109].mxu0  ;;  %3004 = vmatprep.subr.bf16.mxu1 %v3214_v11  ;;  %v1426_v29 = vpack.c.bf16 %v1395_v6, %v1394_v39  ;;  %v1396_v18 = vld [vmem:[#allocation2 + $0x110] sm:$0xff] }
 0x202   :  { %v1120_v20 = vadd.f32 %v1119_v23, %v3619_v24  ;;  %v2917_v27 = vpop.f32.mrb[110].mxu0  ;;  %2956 = vmatprep.mubr.msk.bf16.mxu1 %vm43_vm0, %v1412_v8  ;;  %v3216_v24 = vld [vmem:[%s3862_s4 + $0x20] sm:$0xff]   ;;  %v1427_v8 = vpack.c.bf16 %v1397_v57, %v1396_v18  ;;  %v1403_v23 = vld [vmem:[#allocation2 + $0x148] sm:$0xff] }
 0x203   :  { %v1276_v54 = vadd.f32 %v1128_v12, %v106_v13  ;;  %v1131_v47 = vadd.f32 %v2917_v27, %v3631_v42  ;;  %v1122_v26 = vpop.f32.mrb[111].mxu0  ;;  %2957 = vmatmul.mubr.msk.bf16.gmra.mrb[36].mxu1 %vm43_vm0, %v1413_v14  ;;  %v1399_v13 = vld [vmem:[#allocation2 + $0x128] sm:$0xff]  ;;  %v1400_v14 = vld [vmem:[#allocation2 + $0x130] sm:$0xff]  ;;  %v1405_v27 = vld [vmem:[#allocation2 + $0x158] sm:$0xff] }
 0x204   :  { %v1274_v35 = vadd.f32 %v1120_v20, %v104_v10  ;;  %v1123_v50 = vadd.f32 %v1122_v26, %v3625_v28  ;;  %3005 = vmatpush3.bf16.msra.mxu1 %v3214_v11  ;;  %v1372_v30 = vld [vmem:[#allocation2 + $0x50] sm:$0xff]  ;;  %v1428_v12 = vpack.c.bf16 %v1399_v13, %v1398_v31  ;;  %v1401_v10 = vld [vmem:[#allocation2 + $0x138] sm:$0xff]  ;;  %v1402_v20 = vld [vmem:[#allocation2 + $0x140] sm:$0xff] }
 0x205   :  { %1325 = vst.msk [vmem:[#allocation2 + $0x70] sm:$0xff] %vm43_vm0, %v1276_v54  ;;  %v1277_v41 = vadd.f32 %v1131_v47, %v107_v22  ;;  %3006 = vmatprep.subr.bf16.mxu1 %v3215_v33  ;;  %v1370_v9 = vld [vmem:[#allocation2 + $0x40] sm:$0xff]  ;;  %v1392_v11 = vld [vmem:[#allocation2 + $0xf0] sm:$0xff]  ;;  %v1430_v22 = vpack.c.bf16 %v1403_v23, %v1402_v20  ;;  %v1407_v54 = vld [vmem:[#allocation2 + $0x168] sm:$0xff] }
 0x206   :  { %1323 = vst.msk [vmem:[#allocation2 + $0x60] sm:$0xff] %vm43_vm0, %v1274_v35  ;;  %v1275_v56 = vadd.f32 %v1123_v50, %v105_v7  ;;  %v1373_v42 = vld [vmem:[#allocation2 + $0x58] sm:$0xff]  ;;  %v1425_v21 = vpack.c.bf16 %v1393_v25, %v1392_v11  ;;  %v1404_v47 = vld [vmem:[#allocation2 + $0x150] sm:$0xff]  ;;  %v1406_v26 = vld [vmem:[#allocation2 + $0x160] sm:$0xff] }
 0x207   :  { %1326 = vst.msk [vmem:[#allocation2 + $0x78] sm:$0xff] %vm43_vm0, %v1277_v41  ;;  %v1371_v52 = vld [vmem:[#allocation2 + $0x48] sm:$0xff]  ;;  %v1415_v49 = vpack.c.bf16 %v1373_v42, %v1372_v30  ;;  %v1431_v7 = vpack.c.bf16 %v1405_v27, %v1404_v47  ;;  %v1432_v35 = vpack.c.bf16 %v1407_v54, %v1406_v26  ;;  %v1409_v50 = vld [vmem:[#allocation2 + $0x178] sm:$0xff]  ;;  %v1408_v41 = vld [vmem:[#allocation2 + $0x170] sm:$0xff] }
 0x208   :  { %1324 = vst.msk [vmem:[#allocation2 + $0x68] sm:$0xff] %vm43_vm0, %v1275_v56  ;;  %v1414_v28 = vpack.c.bf16 %v1371_v52, %v1370_v9  ;;  %3007 = vmatpush3.bf16.msra.mxu1 %v3215_v33  ;;  %v1429_v33 = vpack.c.bf16 %v1401_v10, %v1400_v14  ;;  %v3784_v56 = vld [vmem:[%s3860_s2] ss:$0 sm:$0xff]  ;;  %s3297_s2 = smov [#allocation6]  }
 0x209   :  { %3008 = vmatprep.subr.bf16.mxu1 %v3216_v24  ;;  %s2400_s25 = sshll.u32 %s3297_s2, 4  ;;  %s2401_s25 = int_to_ptr.vmem [resolvable:$true] %s2400_s25 }
 0x20a   :  { %2960 = vmatprep.mubr.msk.bf16.mxu1 %vm43_vm0, %v1414_v28  ;;  %s3242_s26 = scalar_lea.vmem %s2401_s25, 6144  ;;  %p3247_p9 = scmp.lt.s32.totalorder %s2401_s25, %s2401_s25 }
 0x20b   :  { %2961 = vmatmul.mubr.msk.bf16.gmra.mrb[40].mxu1 %vm43_vm0, %v1415_v49  ;;  %p3243_p8 = scmp.ne.s32.totalorder %s2401_s25, %s3242_s26  ;;  %p3248_p10 = scmp.lt.s32.totalorder %s3242_s26, %s3242_s26 }
 0x20c   :  { %3009 = vmatpush3.bf16.msra.mxu1 %v3216_v24  ;;  %v1376_v45 = vld [vmem:[#allocation2 + $0x70] sm:$0xff]  ;;  %v1433_v24 = vpack.c.bf16 %v1409_v50, %v1408_v41 }
 0x20d   :  { %3010 = vmatprep.subr.bf16.mxu1 %v3217_v36  ;;  %v1374_v38 = vld [vmem:[#allocation2 + $0x60] sm:$0xff]  ;;  %p3249_p11 = por %p3248_p10, %p3247_p9 }
 0x20e   :  { %v1377_v43 = vld [vmem:[#allocation2 + $0x78] sm:$0xff] }
 0x20f   :  { %v1375_v32 = vld [vmem:[#allocation2 + $0x68] sm:$0xff]  ;;  %v1417_v40 = vpack.c.bf16 %v1377_v43, %v1376_v45  ;;  %p3250_p12 = pnand %p3249_p11, %p3243_p8 }
 0x210   :  { %v1416_v63 = vpack.c.bf16 %v1375_v32, %v1374_v38  ;;  %3011 = vmatpush3.bf16.msra.mxu1 %v3217_v36 }
 0x211   :  { %3012 = vmatprep.subr.bf16.mxu1 %v3218_v44 }
 0x212   :  { %2964 = vmatprep.mubr.msk.bf16.mxu1 %vm43_vm0, %v1416_v63 }
 0x213   :  { %2965 = vmatmul.mubr.msk.bf16.gmra.mrb[44].mxu1 %vm43_vm0, %v1417_v40 }
 0x214   :  { %2968 = vmatprep.mubr.msk.bf16.mxu1 %vm43_vm0, %v1418_v58  ;;  %3013 = vmatpush3.bf16.msra.mxu1 %v3218_v44 }
 0x215   :  { %3014 = vmatprep.subr.bf16.mxu1 %v3219_v15 }
 0x218   :  { %3015 = vmatpush3.bf16.msra.mxu1 %v3219_v15 }
 0x21b   :  { %2969 = vmatmul.mubr.msk.bf16.gmra.mrb[48].mxu1 %vm43_vm0, %v1419_v59 }
 0x21c   :  { %2972 = vmatprep.mubr.msk.bf16.mxu1 %vm43_vm0, %v1420_v17 }
 0x223   :  { %2973 = vmatmul.mubr.msk.bf16.gmra.mrb[52].mxu1 %vm43_vm0, %v1421_v53 }
 0x224   :  { %2976 = vmatprep.mubr.msk.bf16.mxu1 %vm43_vm0, %v1422_v61 }
 0x22b   :  { %2977 = vmatmul.mubr.msk.bf16.gmra.mrb[56].mxu1 %vm43_vm0, %v1423_v4 }
 0x22c   :  { %2980 = vmatprep.mubr.msk.bf16.mxu1 %vm43_vm0, %v1424_v19 }
 0x233   :  { %2981 = vmatmul.mubr.msk.bf16.gmra.mrb[60].mxu1 %vm43_vm0, %v1425_v21 }
 0x234   :  { %2984 = vmatprep.mubr.msk.bf16.mxu1 %vm43_vm0, %v1426_v29 }
 0x23b   :  { %2985 = vmatmul.mubr.msk.bf16.gmra.mrb[64].mxu1 %vm43_vm0, %v1427_v8 }
 0x23c   :  { %2988 = vmatprep.mubr.msk.bf16.mxu1 %vm43_vm0, %v1428_v12 }
 0x243   :  { %2989 = vmatmul.mubr.msk.bf16.gmra.mrb[68].mxu1 %vm43_vm0, %v1429_v33 }
 0x244   :  { %2992 = vmatprep.mubr.msk.bf16.mxu1 %vm43_vm0, %v1430_v22 }
 0x24b   :  { %2993 = vmatmul.mubr.msk.bf16.gmra.mrb[72].mxu1 %vm43_vm0, %v1431_v7 }
 0x24c   :  { %2996 = vmatprep.mubr.msk.bf16.mxu1 %vm43_vm0, %v1432_v35 }
 0x253   :  { %2997 = vmatmul.mubr.msk.bf16.gmra.mrb[76].mxu1 %vm43_vm0, %v1433_v24 }
 0x2ce   :  { %v2954_v42 = vpop.f32.mrb[32].mxu1 }
 0x2cf   :  { %v1564_v9 = vadd.f32 %v2954_v42, %v3784_v56  ;;  %v1555_v52 = vpop.f32.mrb[33].mxu1 }
 0x2d0   :  { %v1556_v28 = vadd.f32 %v3784_v56, %v1555_v52  ;;  %v2955_v30 = vpop.f32.mrb[34].mxu1 }
 0x2d1   :  { %v1748_v49 = vmax.f32 %v1564_v9, 0.0  ;;  %v1567_v36 = vadd.f32 %v2955_v30, %v3784_v56  ;;  %v1558_v44 = vpop.f32.mrb[35].mxu1 }
 0x2d2   :  { %v1746_v43 = vmax.f32 %v1556_v28, 0.0  ;;  %v1559_v38 = vadd.f32 %v3784_v56, %v1558_v44 }
 0x2d3   :  { %1796 = vst [vmem:[#allocation6 + $0x10] sm:$0xff] %v1748_v49  ;;  %v1749_v32 = vmax.f32 %v1567_v36, 0.0 }
 0x2d4   :  { %1794 = vst [vmem:[#allocation6] sm:$0xff] %v1746_v43  ;;  %v1747_v16 = vmax.f32 %v1559_v38, 0.0 }
 0x2d5   :  { %1797 = vst [vmem:[#allocation6 + $0x18] sm:$0xff] %v1749_v32  ;;  %v1843_v63 = vpack.c.bf16 %v1749_v32, %v1748_v49 }
 0x2d6   :  { %1795 = vst [vmem:[#allocation6 + $0x8] sm:$0xff] %v1747_v16  ;;  %v1842_v45 = vpack.c.bf16 %v1747_v16, %v1746_v43  ;;  %v2958_v40 = vpop.f32.mrb[36].mxu1 }
 0x2d7   :  { %v1580_v3 = vadd.f32 %v2958_v40, %v3784_v56  ;;  %v1571_v15 = vpop.f32.mrb[37].mxu1 }
 0x2d8   :  { %v1572_v58 = vadd.f32 %v3784_v56, %v1571_v15  ;;  %v2959_v1 = vpop.f32.mrb[38].mxu1  ;;  %3016 = vmatprep.mubr.bf16.mxu1 %v1842_v45 }
 0x2d9   :  { %v1752_v46 = vmax.f32 %v1580_v3, 0.0  ;;  %v1583_v5 = vadd.f32 %v2959_v1, %v3784_v56  ;;  %v1574_v59 = vpop.f32.mrb[39].mxu1  ;;  %3017 = vmatmul.mubr.bf16.vlgmr.msra.gmra.mrb[80].mxu1 %v1843_v63 }
 0x2da   :  { %v1750_v34 = vmax.f32 %v1572_v58, 0.0  ;;  %v1575_v17 = vadd.f32 %v3784_v56, %v1574_v59 }
 0x2db   :  { %1800 = vst [vmem:[#allocation6 + $0x30] sm:$0xff] %v1752_v46  ;;  %v1753_v60 = vmax.f32 %v1583_v5, 0.0 }
 0x2dc   :  { %1798 = vst [vmem:[#allocation6 + $0x20] sm:$0xff] %v1750_v34  ;;  %v1751_v48 = vmax.f32 %v1575_v17, 0.0 }
 0x2dd   :  { %1801 = vst [vmem:[#allocation6 + $0x38] sm:$0xff] %v1753_v60  ;;  %v1845_v51 = vpack.c.bf16 %v1753_v60, %v1752_v46 }
 0x2de   :  { %1799 = vst [vmem:[#allocation6 + $0x28] sm:$0xff] %v1751_v48  ;;  %v1844_v53 = vpack.c.bf16 %v1751_v48, %v1750_v34  ;;  %v2962_v62 = vpop.f32.mrb[40].mxu1 }
 0x2df   :  { %v1596_v61 = vadd.f32 %v2962_v62, %v3784_v56  ;;  %v1587_v2 = vpop.f32.mrb[41].mxu1 }
 0x2e0   :  { %v1588_v0 = vadd.f32 %v3784_v56, %v1587_v2  ;;  %v2963_v37 = vpop.f32.mrb[42].mxu1  ;;  %3020 = vmatprep.mubr.bf16.mxu1 %v1844_v53 }
 0x2e1   :  { %v1756_v4 = vmax.f32 %v1596_v61, 0.0  ;;  %v1599_v55 = vadd.f32 %v2963_v37, %v3784_v56  ;;  %v1590_v19 = vpop.f32.mrb[43].mxu1  ;;  %3021 = vmatmul.mubr.bf16.gmra.mrb[84].mxu1 %v1845_v51 }
 0x2e2   :  { %v1754_v25 = vmax.f32 %v1588_v0, 0.0  ;;  %v1591_v6 = vadd.f32 %v3784_v56, %v1590_v19 }
 0x2e3   :  { %1804 = vst [vmem:[#allocation6 + $0x50] sm:$0xff] %v1756_v4  ;;  %v1757_v11 = vmax.f32 %v1599_v55, 0.0 }
 0x2e4   :  { %1802 = vst [vmem:[#allocation6 + $0x40] sm:$0xff] %v1754_v25  ;;  %v1755_v21 = vmax.f32 %v1591_v6, 0.0 }
 0x2e5   :  { %1805 = vst [vmem:[#allocation6 + $0x58] sm:$0xff] %v1757_v11  ;;  %v1847_v39 = vpack.c.bf16 %v1757_v11, %v1756_v4 }
 0x2e6   :  { %1803 = vst [vmem:[#allocation6 + $0x48] sm:$0xff] %v1755_v21  ;;  %v1846_v29 = vpack.c.bf16 %v1755_v21, %v1754_v25  ;;  %v2966_v57 = vpop.f32.mrb[44].mxu1 }
 0x2e7   :  { %v1612_v13 = vadd.f32 %v2966_v57, %v3784_v56  ;;  %v1603_v18 = vpop.f32.mrb[45].mxu1 }
 0x2e8   :  { %v1604_v8 = vadd.f32 %v3784_v56, %v1603_v18  ;;  %v2967_v31 = vpop.f32.mrb[46].mxu1  ;;  %3024 = vmatprep.mubr.bf16.mxu1 %v1846_v29 }
 0x2e9   :  { %v1760_v12 = vmax.f32 %v1612_v13, 0.0  ;;  %v1615_v10 = vadd.f32 %v2967_v31, %v3784_v56  ;;  %v1606_v23 = vpop.f32.mrb[47].mxu1  ;;  %3025 = vmatmul.mubr.bf16.gmra.mrb[88].mxu1 %v1847_v39 }
 0x2ea   :  { %v1758_v14 = vmax.f32 %v1604_v8, 0.0  ;;  %v1607_v33 = vadd.f32 %v3784_v56, %v1606_v23 }
 0x2eb   :  { %1808 = vst [vmem:[#allocation6 + $0x70] sm:$0xff] %v1760_v12  ;;  %v1761_v20 = vmax.f32 %v1615_v10, 0.0 }
 0x2ec   :  { %1806 = vst [vmem:[#allocation6 + $0x60] sm:$0xff] %v1758_v14  ;;  %v1759_v22 = vmax.f32 %v1607_v33, 0.0 }
 0x2ed   :  { %1809 = vst [vmem:[#allocation6 + $0x78] sm:$0xff] %v1761_v20  ;;  %v1849_v27 = vpack.c.bf16 %v1761_v20, %v1760_v12 }
 0x2ee   :  { %1807 = vst [vmem:[#allocation6 + $0x68] sm:$0xff] %v1759_v22  ;;  %v1848_v54 = vpack.c.bf16 %v1759_v22, %v1758_v14  ;;  %v2970_v47 = vpop.f32.mrb[48].mxu1 }
 0x2ef   :  { %v1628_v7 = vadd.f32 %v2970_v47, %v3784_v56  ;;  %v1619_v26 = vpop.f32.mrb[49].mxu1 }
 0x2f0   :  { %v1620_v35 = vadd.f32 %v3784_v56, %v1619_v26  ;;  %v2971_v50 = vpop.f32.mrb[50].mxu1  ;;  %3028 = vmatprep.mubr.bf16.mxu1 %v1848_v54 }
 0x2f1   :  { %v1764_v41 = vmax.f32 %v1628_v7, 0.0  ;;  %v1631_v24 = vadd.f32 %v2971_v50, %v3784_v56  ;;  %v1622_v42 = vpop.f32.mrb[51].mxu1  ;;  %3029 = vmatmul.mubr.bf16.gmra.mrb[92].mxu1 %v1849_v27 }
 0x2f2   :  { %v1762_v9 = vmax.f32 %v1620_v35, 0.0  ;;  %v1623_v52 = vadd.f32 %v3784_v56, %v1622_v42 }
 0x2f3   :  { %1812 = vst [vmem:[#allocation6 + $0x90] sm:$0xff] %v1764_v41  ;;  %v1765_v28 = vmax.f32 %v1631_v24, 0.0 }
 0x2f4   :  { %1810 = vst [vmem:[#allocation6 + $0x80] sm:$0xff] %v1762_v9  ;;  %v1763_v30 = vmax.f32 %v1623_v52, 0.0 }
 0x2f5   :  { %1813 = vst [vmem:[#allocation6 + $0x98] sm:$0xff] %v1765_v28  ;;  %v1851_v49 = vpack.c.bf16 %v1765_v28, %v1764_v41 }
 0x2f6   :  { %1811 = vst [vmem:[#allocation6 + $0x88] sm:$0xff] %v1763_v30  ;;  %v1850_v36 = vpack.c.bf16 %v1763_v30, %v1762_v9  ;;  %v2974_v44 = vpop.f32.mrb[52].mxu1 }
 0x2f7   :  { %v1644_v43 = vadd.f32 %v2974_v44, %v3784_v56  ;;  %v1635_v38 = vpop.f32.mrb[53].mxu1 }
 0x2f8   :  { %v1636_v32 = vadd.f32 %v3784_v56, %v1635_v38  ;;  %v2975_v16 = vpop.f32.mrb[54].mxu1  ;;  %3032 = vmatprep.mubr.bf16.mxu1 %v1850_v36 }
 0x2f9   :  { %v1768_v63 = vmax.f32 %v1644_v43, 0.0  ;;  %v1647_v45 = vadd.f32 %v2975_v16, %v3784_v56  ;;  %v1638_v40 = vpop.f32.mrb[55].mxu1  ;;  %3033 = vmatmul.mubr.bf16.gmra.mrb[96].mxu1 %v1851_v49 }
 0x2fa   :  { %v1766_v3 = vmax.f32 %v1636_v32, 0.0  ;;  %v1639_v15 = vadd.f32 %v3784_v56, %v1638_v40 }
 0x2fb   :  { %1816 = vst [vmem:[#allocation6 + $0xb0] sm:$0xff] %v1768_v63  ;;  %v1769_v58 = vmax.f32 %v1647_v45, 0.0 }
 0x2fc   :  { %1814 = vst [vmem:[#allocation6 + $0xa0] sm:$0xff] %v1766_v3  ;;  %v1767_v1 = vmax.f32 %v1639_v15, 0.0 }
 0x2fd   :  { %1817 = vst [vmem:[#allocation6 + $0xb8] sm:$0xff] %v1769_v58  ;;  %v1853_v46 = vpack.c.bf16 %v1769_v58, %v1768_v63 }
 0x2fe   :  { %1815 = vst [vmem:[#allocation6 + $0xa8] sm:$0xff] %v1767_v1  ;;  %v1852_v5 = vpack.c.bf16 %v1767_v1, %v1766_v3  ;;  %v2978_v59 = vpop.f32.mrb[56].mxu1 }
 0x2ff   :  { %v1660_v34 = vadd.f32 %v2978_v59, %v3784_v56  ;;  %v1651_v17 = vpop.f32.mrb[57].mxu1 }
 0x300   :  { %v1652_v60 = vadd.f32 %v3784_v56, %v1651_v17  ;;  %v2979_v48 = vpop.f32.mrb[58].mxu1  ;;  %3036 = vmatprep.mubr.bf16.mxu1 %v1852_v5 }
 0x301   :  { %v1772_v51 = vmax.f32 %v1660_v34, 0.0  ;;  %v1663_v53 = vadd.f32 %v2979_v48, %v3784_v56  ;;  %v1654_v62 = vpop.f32.mrb[59].mxu1  ;;  %3037 = vmatmul.mubr.bf16.gmra.mrb[100].mxu1 %v1853_v46 }
 0x302   :  { %v1770_v61 = vmax.f32 %v1652_v60, 0.0  ;;  %v1655_v2 = vadd.f32 %v3784_v56, %v1654_v62 }
 0x303   :  { %1820 = vst [vmem:[#allocation6 + $0xd0] sm:$0xff] %v1772_v51  ;;  %v1773_v0 = vmax.f32 %v1663_v53, 0.0 }
 0x304   :  { %1818 = vst [vmem:[#allocation6 + $0xc0] sm:$0xff] %v1770_v61  ;;  %v1771_v37 = vmax.f32 %v1655_v2, 0.0 }
 0x305   :  { %1821 = vst [vmem:[#allocation6 + $0xd8] sm:$0xff] %v1773_v0  ;;  %v1855_v4 = vpack.c.bf16 %v1773_v0, %v1772_v51 }
 0x306   :  { %1819 = vst [vmem:[#allocation6 + $0xc8] sm:$0xff] %v1771_v37  ;;  %v1854_v55 = vpack.c.bf16 %v1771_v37, %v1770_v61  ;;  %v2982_v19 = vpop.f32.mrb[60].mxu1 }
 0x307   :  { %v1676_v25 = vadd.f32 %v2982_v19, %v3784_v56  ;;  %v1667_v6 = vpop.f32.mrb[61].mxu1 }
 0x308   :  { %v1668_v11 = vadd.f32 %v3784_v56, %v1667_v6  ;;  %v2983_v21 = vpop.f32.mrb[62].mxu1  ;;  %3040 = vmatprep.mubr.bf16.mxu1 %v1854_v55 }
 0x309   :  { %v1776_v39 = vmax.f32 %v1676_v25, 0.0  ;;  %v1679_v29 = vadd.f32 %v2983_v21, %v3784_v56  ;;  %v1670_v57 = vpop.f32.mrb[63].mxu1  ;;  %3041 = vmatmul.mubr.bf16.gmra.mrb[104].mxu1 %v1855_v4 }
 0x30a   :  { %v1774_v13 = vmax.f32 %v1668_v11, 0.0  ;;  %v1671_v18 = vadd.f32 %v3784_v56, %v1670_v57 }
 0x30b   :  { %1824 = vst [vmem:[#allocation6 + $0xf0] sm:$0xff] %v1776_v39  ;;  %v1777_v8 = vmax.f32 %v1679_v29, 0.0 }
 0x30c   :  { %1822 = vst [vmem:[#allocation6 + $0xe0] sm:$0xff] %v1774_v13  ;;  %v1775_v31 = vmax.f32 %v1671_v18, 0.0 }
 0x30d   :  { %1825 = vst [vmem:[#allocation6 + $0xf8] sm:$0xff] %v1777_v8  ;;  %v1857_v12 = vpack.c.bf16 %v1777_v8, %v1776_v39 }
 0x30e   :  { %1823 = vst [vmem:[#allocation6 + $0xe8] sm:$0xff] %v1775_v31  ;;  %v1856_v10 = vpack.c.bf16 %v1775_v31, %v1774_v13  ;;  %v2986_v23 = vpop.f32.mrb[64].mxu1 }
 0x30f   :  { %v1692_v14 = vadd.f32 %v2986_v23, %v3784_v56  ;;  %v1683_v33 = vpop.f32.mrb[65].mxu1 }
 0x310   :  { %v1684_v20 = vadd.f32 %v3784_v56, %v1683_v33  ;;  %v2987_v22 = vpop.f32.mrb[66].mxu1  ;;  %3044 = vmatprep.mubr.bf16.mxu1 %v1856_v10 }
 0x311   :  { %v1780_v27 = vmax.f32 %v1692_v14, 0.0  ;;  %v1695_v54 = vadd.f32 %v2987_v22, %v3784_v56  ;;  %v1686_v47 = vpop.f32.mrb[67].mxu1  ;;  %3045 = vmatmul.mubr.bf16.gmra.mrb[108].mxu1 %v1857_v12 }
 0x312   :  { %v1778_v7 = vmax.f32 %v1684_v20, 0.0  ;;  %v1687_v26 = vadd.f32 %v3784_v56, %v1686_v47 }
 0x313   :  { %1828 = vst [vmem:[#allocation6 + $0x110] sm:$0xff] %v1780_v27  ;;  %v1781_v35 = vmax.f32 %v1695_v54, 0.0 }
 0x314   :  { %1826 = vst [vmem:[#allocation6 + $0x100] sm:$0xff] %v1778_v7  ;;  %v1779_v50 = vmax.f32 %v1687_v26, 0.0 }
 0x315   :  { %1829 = vst [vmem:[#allocation6 + $0x118] sm:$0xff] %v1781_v35  ;;  %v1859_v41 = vpack.c.bf16 %v1781_v35, %v1780_v27 }
 0x316   :  { %1827 = vst [vmem:[#allocation6 + $0x108] sm:$0xff] %v1779_v50  ;;  %v1858_v24 = vpack.c.bf16 %v1779_v50, %v1778_v7  ;;  %v2990_v42 = vpop.f32.mrb[68].mxu1 }
 0x317   :  { %v1708_v9 = vadd.f32 %v2990_v42, %v3784_v56  ;;  %v1699_v52 = vpop.f32.mrb[69].mxu1 }
 0x318   :  { %v1700_v28 = vadd.f32 %v3784_v56, %v1699_v52  ;;  %v2991_v30 = vpop.f32.mrb[70].mxu1  ;;  %3048 = vmatprep.mubr.bf16.mxu1 %v1858_v24 }
 0x319   :  { %v1784_v49 = vmax.f32 %v1708_v9, 0.0  ;;  %v1711_v36 = vadd.f32 %v2991_v30, %v3784_v56  ;;  %v1702_v44 = vpop.f32.mrb[71].mxu1  ;;  %3049 = vmatmul.mubr.bf16.gmra.mrb[112].mxu1 %v1859_v41 }
 0x31a   :  { %v1782_v43 = vmax.f32 %v1700_v28, 0.0  ;;  %v1703_v38 = vadd.f32 %v3784_v56, %v1702_v44 }
 0x31b   :  { %1832 = vst [vmem:[#allocation6 + $0x130] sm:$0xff] %v1784_v49  ;;  %v1785_v32 = vmax.f32 %v1711_v36, 0.0 }
 0x31c   :  { %1830 = vst [vmem:[#allocation6 + $0x120] sm:$0xff] %v1782_v43  ;;  %v1783_v16 = vmax.f32 %v1703_v38, 0.0 }
 0x31d   :  { %1833 = vst [vmem:[#allocation6 + $0x138] sm:$0xff] %v1785_v32  ;;  %v1861_v63 = vpack.c.bf16 %v1785_v32, %v1784_v49 }
 0x31e   :  { %1831 = vst [vmem:[#allocation6 + $0x128] sm:$0xff] %v1783_v16  ;;  %v1860_v45 = vpack.c.bf16 %v1783_v16, %v1782_v43  ;;  %v2994_v40 = vpop.f32.mrb[72].mxu1 }
 0x31f   :  { %v1724_v3 = vadd.f32 %v2994_v40, %v3784_v56  ;;  %v1715_v15 = vpop.f32.mrb[73].mxu1 }
 0x320   :  { %v1716_v58 = vadd.f32 %v3784_v56, %v1715_v15  ;;  %v2995_v1 = vpop.f32.mrb[74].mxu1  ;;  %3052 = vmatprep.mubr.bf16.mxu1 %v1860_v45 }
 0x321   :  { %v1788_v46 = vmax.f32 %v1724_v3, 0.0  ;;  %v1727_v5 = vadd.f32 %v2995_v1, %v3784_v56  ;;  %v1718_v59 = vpop.f32.mrb[75].mxu1  ;;  %3053 = vmatmul.mubr.bf16.gmra.mrb[116].mxu1 %v1861_v63 }
 0x322   :  { %v1786_v34 = vmax.f32 %v1716_v58, 0.0  ;;  %v1719_v17 = vadd.f32 %v3784_v56, %v1718_v59 }
 0x323   :  { %1836 = vst [vmem:[#allocation6 + $0x150] sm:$0xff] %v1788_v46  ;;  %v1789_v60 = vmax.f32 %v1727_v5, 0.0 }
 0x324   :  { %1834 = vst [vmem:[#allocation6 + $0x140] sm:$0xff] %v1786_v34  ;;  %v1787_v48 = vmax.f32 %v1719_v17, 0.0 }
 0x325   :  { %1837 = vst [vmem:[#allocation6 + $0x158] sm:$0xff] %v1789_v60  ;;  %v1863_v51 = vpack.c.bf16 %v1789_v60, %v1788_v46 }
 0x326   :  { %1835 = vst [vmem:[#allocation6 + $0x148] sm:$0xff] %v1787_v48  ;;  %v1862_v53 = vpack.c.bf16 %v1787_v48, %v1786_v34  ;;  %v2998_v62 = vpop.f32.mrb[76].mxu1 }
 0x327   :  { %v1740_v61 = vadd.f32 %v2998_v62, %v3784_v56  ;;  %v1731_v2 = vpop.f32.mrb[77].mxu1 }
 0x328   :  { %v1732_v0 = vadd.f32 %v3784_v56, %v1731_v2  ;;  %v2999_v37 = vpop.f32.mrb[78].mxu1  ;;  %3056 = vmatprep.mubr.bf16.mxu1 %v1862_v53 }
 0x329   :  { %v1792_v4 = vmax.f32 %v1740_v61, 0.0  ;;  %v1743_v55 = vadd.f32 %v2999_v37, %v3784_v56  ;;  %v1734_v19 = vpop.f32.mrb[79].mxu1  ;;  %3057 = vmatmul.mubr.bf16.gmra.mrb[120].mxu1 %v1863_v51 }
 0x32a   :  { %v1790_v25 = vmax.f32 %v1732_v0, 0.0  ;;  %v1735_v6 = vadd.f32 %v3784_v56, %v1734_v19 }
 0x32b   :  { %1840 = vst [vmem:[#allocation6 + $0x170] sm:$0xff] %v1792_v4  ;;  %v1793_v11 = vmax.f32 %v1743_v55, 0.0 }
 0x32c   :  { %1838 = vst [vmem:[#allocation6 + $0x160] sm:$0xff] %v1790_v25  ;;  %v1791_v21 = vmax.f32 %v1735_v6, 0.0 }
 0x32d   :  { %1841 = vst [vmem:[#allocation6 + $0x178] sm:$0xff] %v1793_v11  ;;  %v1865_v39 = vpack.c.bf16 %v1793_v11, %v1792_v4 }
 0x32e   :  { %1839 = vst [vmem:[#allocation6 + $0x168] sm:$0xff] %v1791_v21  ;;  %v1864_v29 = vpack.c.bf16 %v1791_v21, %v1790_v25 }
 0x330   :  { %3060 = vmatprep.mubr.bf16.mxu1 %v1864_v29 }
 0x331   :  { %3061 = vmatmul.mubr.bf16.gmra.mrb[124].mxu1 %v1865_v39 }
 0x332   :  { %3253 = shalt.err (!%p3250_p12)
}
 0x333   :  { %s3254_s29 = scalar_lea.hbm %s3863_s5, 6144 }
 0x334   :  { %p3255_p13 = scmp.ne.s32.totalorder %s3863_s5, %s3254_s29  ;;  %p3258_p0 = scmp.lt.u32.totalorder %s3254_s29, %s3863_s5 }
 0x336   :  { %p3260_p1 = pnand %p3258_p0, %p3255_p13 }
 0x338   :  { %3263 = shalt.err (!%p3260_p1)
}
 0x339   :  { %s3298_s9 = smov 128   ;;  %s3299_s3 = smov 8  }
 0x33a   :  { %2406 = dma.vmem_to_hbm [thread:$0]  %s2401_s25, 6144, %s3863_s5, [#allocation5], %s3298_s9, %s3298_s9, %s3299_s3  }
 0x33b   :  { %s3300_s5 = smov [#allocation7]  }
 0x33c   :  { %s2412_s12 = sshll.u32 %s3300_s5, 4  ;;  %s2413_s12 = int_to_ptr.vmem [resolvable:$true] %s2412_s12 }
 0x33d   :  { %s3264_s13 = scalar_lea.vmem %s2413_s12, 3072  ;;  %p3269_p3 = scmp.lt.s32.totalorder %s2413_s12, %s2413_s12 }
 0x33e   :  { %p3265_p2 = scmp.ne.s32.totalorder %s2413_s12, %s3264_s13  ;;  %p3270_p4 = scmp.lt.s32.totalorder %s3264_s13, %s3264_s13 }
 0x340   :  { %p3271_p5 = por %p3270_p4, %p3269_p3 }
 0x342   :  { %p3272_p6 = pnand %p3271_p5, %p3265_p2 }
 0x3ac   :  { %v3018_v56 = vpop.f32.mrb[80].mxu1 }
 0x3ad   :  { %v1964_v57 = vpop.f32.mrb[81].mxu1 }
 0x3ae   :  { %v3019_v13 = vpop.f32.mrb[82].mxu1 }
 0x3af   :  { %v2662_v18 = vpack.c.bf16 %v3019_v13, %v3018_v56  ;;  %v1967_v8 = vpop.f32.mrb[83].mxu1 }
 0x3b0   :  { %v2657_v31 = vpack.c.bf16 %v1967_v8, %v1964_v57 }
 0x3b1   :  { %2774 = vst [vmem:[#allocation7 + $0x8] sm:$0xff] %v2662_v18  }
 0x3b2   :  { %2658 = vst [vmem:[#allocation7] sm:$0xff] %v2657_v31  }
 0x3b4   :  { %v3022_v12 = vpop.f32.mrb[84].mxu1 }
 0x3b5   :  { %v1980_v10 = vpop.f32.mrb[85].mxu1 }
 0x3b6   :  { %v3023_v23 = vpop.f32.mrb[86].mxu1 }
 0x3b7   :  { %v2672_v14 = vpack.c.bf16 %v3023_v23, %v3022_v12  ;;  %v1983_v33 = vpop.f32.mrb[87].mxu1 }
 0x3b8   :  { %v2667_v20 = vpack.c.bf16 %v1983_v33, %v1980_v10 }
 0x3b9   :  { %2776 = vst [vmem:[#allocation7 + $0x18] sm:$0xff] %v2672_v14  }
 0x3ba   :  { %2775 = vst [vmem:[#allocation7 + $0x10] sm:$0xff] %v2667_v20  }
 0x3bc   :  { %v3026_v22 = vpop.f32.mrb[88].mxu1 }
 0x3bd   :  { %v1996_v27 = vpop.f32.mrb[89].mxu1 }
 0x3be   :  { %v3027_v54 = vpop.f32.mrb[90].mxu1 }
 0x3bf   :  { %v2682_v47 = vpack.c.bf16 %v3027_v54, %v3026_v22  ;;  %v1999_v7 = vpop.f32.mrb[91].mxu1 }
 0x3c0   :  { %v2677_v26 = vpack.c.bf16 %v1999_v7, %v1996_v27 }
 0x3c1   :  { %2778 = vst [vmem:[#allocation7 + $0x28] sm:$0xff] %v2682_v47  }
 0x3c2   :  { %2777 = vst [vmem:[#allocation7 + $0x20] sm:$0xff] %v2677_v26  }
 0x3c4   :  { %v3030_v35 = vpop.f32.mrb[92].mxu1 }
 0x3c5   :  { %v2012_v50 = vpop.f32.mrb[93].mxu1 }
 0x3c6   :  { %v3031_v41 = vpop.f32.mrb[94].mxu1 }
 0x3c7   :  { %v2692_v24 = vpack.c.bf16 %v3031_v41, %v3030_v35  ;;  %v2015_v42 = vpop.f32.mrb[95].mxu1 }
 0x3c8   :  { %v2687_v9 = vpack.c.bf16 %v2015_v42, %v2012_v50 }
 0x3c9   :  { %2780 = vst [vmem:[#allocation7 + $0x38] sm:$0xff] %v2692_v24  }
 0x3ca   :  { %2779 = vst [vmem:[#allocation7 + $0x30] sm:$0xff] %v2687_v9  }
 0x3cc   :  { %v3034_v52 = vpop.f32.mrb[96].mxu1 }
 0x3cd   :  { %v2028_v28 = vpop.f32.mrb[97].mxu1 }
 0x3ce   :  { %v3035_v30 = vpop.f32.mrb[98].mxu1 }
 0x3cf   :  { %v2702_v49 = vpack.c.bf16 %v3035_v30, %v3034_v52  ;;  %v2031_v36 = vpop.f32.mrb[99].mxu1 }
 0x3d0   :  { %v2697_v44 = vpack.c.bf16 %v2031_v36, %v2028_v28 }
 0x3d1   :  { %2782 = vst [vmem:[#allocation7 + $0x48] sm:$0xff] %v2702_v49  }
 0x3d2   :  { %2781 = vst [vmem:[#allocation7 + $0x40] sm:$0xff] %v2697_v44  }
 0x3d4   :  { %v3038_v43 = vpop.f32.mrb[100].mxu1 }
 0x3d5   :  { %v2044_v38 = vpop.f32.mrb[101].mxu1 }
 0x3d6   :  { %v3039_v32 = vpop.f32.mrb[102].mxu1 }
 0x3d7   :  { %v2712_v16 = vpack.c.bf16 %v3039_v32, %v3038_v43  ;;  %v2047_v63 = vpop.f32.mrb[103].mxu1 }
 0x3d8   :  { %v2707_v45 = vpack.c.bf16 %v2047_v63, %v2044_v38 }
 0x3d9   :  { %2784 = vst [vmem:[#allocation7 + $0x58] sm:$0xff] %v2712_v16  }
 0x3da   :  { %2783 = vst [vmem:[#allocation7 + $0x50] sm:$0xff] %v2707_v45  }
 0x3dc   :  { %v3042_v40 = vpop.f32.mrb[104].mxu1 }
 0x3dd   :  { %v2060_v3 = vpop.f32.mrb[105].mxu1 }
 0x3de   :  { %v3043_v15 = vpop.f32.mrb[106].mxu1 }
 0x3df   :  { %v2722_v58 = vpack.c.bf16 %v3043_v15, %v3042_v40  ;;  %v2063_v1 = vpop.f32.mrb[107].mxu1 }
 0x3e0   :  { %v2717_v46 = vpack.c.bf16 %v2063_v1, %v2060_v3 }
 0x3e1   :  { %2786 = vst [vmem:[#allocation7 + $0x68] sm:$0xff] %v2722_v58  }
 0x3e2   :  { %2785 = vst [vmem:[#allocation7 + $0x60] sm:$0xff] %v2717_v46  }
 0x3e4   :  { %v3046_v5 = vpop.f32.mrb[108].mxu1 }
 0x3e5   :  { %v2076_v59 = vpop.f32.mrb[109].mxu1 }
 0x3e6   :  { %v3047_v34 = vpop.f32.mrb[110].mxu1 }
 0x3e7   :  { %v2732_v17 = vpack.c.bf16 %v3047_v34, %v3046_v5  ;;  %v2079_v60 = vpop.f32.mrb[111].mxu1 }
 0x3e8   :  { %v2727_v48 = vpack.c.bf16 %v2079_v60, %v2076_v59 }
 0x3e9   :  { %2788 = vst [vmem:[#allocation7 + $0x78] sm:$0xff] %v2732_v17  }
 0x3ea   :  { %2787 = vst [vmem:[#allocation7 + $0x70] sm:$0xff] %v2727_v48  }
 0x3ec   :  { %v3050_v51 = vpop.f32.mrb[112].mxu1 }
 0x3ed   :  { %v2092_v53 = vpop.f32.mrb[113].mxu1 }
 0x3ee   :  { %v3051_v62 = vpop.f32.mrb[114].mxu1 }
 0x3ef   :  { %v2742_v61 = vpack.c.bf16 %v3051_v62, %v3050_v51  ;;  %v2095_v2 = vpop.f32.mrb[115].mxu1 }
 0x3f0   :  { %v2737_v0 = vpack.c.bf16 %v2095_v2, %v2092_v53 }
 0x3f1   :  { %2790 = vst [vmem:[#allocation7 + $0x88] sm:$0xff] %v2742_v61  }
 0x3f2   :  { %2789 = vst [vmem:[#allocation7 + $0x80] sm:$0xff] %v2737_v0  }
 0x3f4   :  { %v3054_v37 = vpop.f32.mrb[116].mxu1 }
 0x3f5   :  { %v2108_v4 = vpop.f32.mrb[117].mxu1 }
 0x3f6   :  { %v3055_v55 = vpop.f32.mrb[118].mxu1 }
 0x3f7   :  { %v2752_v19 = vpack.c.bf16 %v3055_v55, %v3054_v37  ;;  %v2111_v25 = vpop.f32.mrb[119].mxu1 }
 0x3f8   :  { %v2747_v6 = vpack.c.bf16 %v2111_v25, %v2108_v4 }
 0x3f9   :  { %2792 = vst [vmem:[#allocation7 + $0x98] sm:$0xff] %v2752_v19  }
 0x3fa   :  { %2791 = vst [vmem:[#allocation7 + $0x90] sm:$0xff] %v2747_v6  }
 0x3fc   :  { %v3058_v11 = vpop.f32.mrb[120].mxu1 }
 0x3fd   :  { %v2124_v21 = vpop.f32.mrb[121].mxu1 }
 0x3fe   :  { %v3059_v39 = vpop.f32.mrb[122].mxu1 }
 0x3ff   :  { %v2762_v29 = vpack.c.bf16 %v3059_v39, %v3058_v11  ;;  %v2127_v56 = vpop.f32.mrb[123].mxu1 }
 0x400   :  { %v2757_v57 = vpack.c.bf16 %v2127_v56, %v2124_v21 }
 0x401   :  { %2794 = vst [vmem:[#allocation7 + $0xa8] sm:$0xff] %v2762_v29  }
 0x402   :  { %2793 = vst [vmem:[#allocation7 + $0xa0] sm:$0xff] %v2757_v57  }
 0x404   :  { %v3062_v13 = vpop.f32.mrb[124].mxu1 }
 0x405   :  { %v2140_v18 = vpop.f32.mrb[125].mxu1 }
 0x406   :  { %v3063_v8 = vpop.f32.mrb[126].mxu1 }
 0x407   :  { %v2772_v31 = vpack.c.bf16 %v3063_v8, %v3062_v13  ;;  %v2143_v12 = vpop.f32.mrb[127].mxu1 }
 0x408   :  { %v2767_v10 = vpack.c.bf16 %v2143_v12, %v2140_v18 }
 0x409   :  { %2796 = vst [vmem:[#allocation7 + $0xb8] sm:$0xff] %v2772_v31  }
 0x40a   :  { %2795 = vst [vmem:[#allocation7 + $0xb0] sm:$0xff] %v2767_v10  }
 0x40b   :  { %3275 = shalt.err (!%p3272_p6)
}
 0x40c   :  { %s3276_s16 = scalar_lea.hbm %s3864_s6, 3072 }
 0x40d   :  { %p3277_p7 = scmp.ne.s32.totalorder %s3864_s6, %s3276_s16  ;;  %p3280_p8 = scmp.lt.u32.totalorder %s3276_s16, %s3864_s6 }
 0x40f   :  { %p3282_p9 = pnand %p3280_p8, %p3277_p7 }
 0x411   :  { %3285 = shalt.err (!%p3282_p9)
}
 0x412   :  { %s3301_s20 = smov 64   ;;  %s3302_s21 = smov 4  }
 0x413   :  { %2418 = dma.vmem_to_hbm [thread:$0]  %s2413_s12, 3072, %s3864_s6, [#allocation8], %s3301_s20, %s3301_s20, %s3302_s21  }
 0x414   :  { %3288 = dma.done.wait [#allocation5], 6144  }
 0x415   :  { %3289 = vsyncadd [#allocation5], 4294961152 }
 0x416   :  { %3290 = dma.done.wait [#allocation8], 3072  }
 0x417   :  { %3291 = vsyncadd [#allocation8], 4294964224 }
 0x418   :  { %2425 = vsyncpa [#allocation4], 1 }
 0x419   :  { %2426 = vsyncpa [#allocation5], 1 }
 0x41a   :  { %2427 = vsyncpa [#allocation8], 1 }

</bundles_post_ra>
